<compile_context>
chip_gen: v7x
topology: tpu7x:2x2x1
jax: 0.10.0
libtpu: 0.0.40
codegen_flags: <defaults>
</compile_context>

<pallas_src>
import functools

import jax
import jax.numpy as jnp
from jax.experimental import pallas as pl
from jax.experimental.pallas import tpu as pltpu

LEAKY_SLOPE = 0.01   # nn.LeakyReLU default
VAR_EPS = 1e-5       # matches `torch.sqrt(torch.var(...) + 1e-05)` in the reference


def _tree_max(parts):
    """log-depth elementwise max over a list of equal-shape arrays."""
    parts = list(parts)
    while len(parts) > 1:
        nxt = [jnp.maximum(parts[i], parts[i + 1]) for i in range(0, len(parts) - 1, 2)]
        if len(parts) % 2:
            nxt.append(parts[-1])
        parts = nxt
    return parts[0]


# --------------------------------------------------------------------------
# Fused forward kernel: single invocation, whole batch on-chip.
# --------------------------------------------------------------------------
def _seminet1_kernel(adj_ref, x_ref, gw_ref, hw_ref, w3b_ref,
                     mu_std_ref, g_dec_ref, bd_ref, *,
                     batch, n, gs, f_n, hid, layer_n, mix_n, out_dim,
                     edge_d, resnet_flags):
    bn = batch * n
    kn = gs * batch * n

    # ---- block-diagonal adjacency, built once in VMEM scratch --------------
    # Diagonal block k = g*B + b holds adj[b, g]; stacked rows are ordered (g, b, i).
    bd_ref[...] = jnp.zeros((kn, kn), jnp.float32)
    for g in range(gs):
        for b in range(batch):
            k = g * batch + b
            bd_ref[k * n:(k + 1) * n, k * n:(k + 1) * n] = adj_ref[b, g]
    a_bd = bd_ref[...]                                                   # (GS*B*N, GS*B*N)

    # ---- node features: (B, N, F) -> (B*N, HID) zero-padded ----------------
    x = x_ref[...].reshape(bn, f_n)
    if f_n < hid:
        x = jnp.concatenate([x, jnp.zeros((bn, hid - f_n), jnp.float32)], axis=1)
    ones_col = jnp.ones((bn, 1), jnp.float32)                            # bias lane

    # ---- GraphMatLayerFast stack: 2 matmuls per layer -----------------------
    for l in range(layer_n):
        x_aug = jnp.concatenate([x, ones_col], axis=1)                   # (BN, HID+1)
        h_packed = jnp.dot(x_aug, gw_ref[l],
                           preferred_element_type=jnp.float32)           # (BN, GS*HID) (+bias)
        # rearrange g from lanes to rows: (BN, GS*HID) -> (GS*BN, HID)
        h_stacked = jnp.concatenate(
            [h_packed[:, g * hid:(g + 1) * hid] for g in range(gs)], axis=0)
        y = jnp.dot(a_bd, h_stacked, preferred_element_type=jnp.float32)  # (GS*BN, HID)
        act = jnp.maximum(y, LEAKY_SLOPE * y)                             # LeakyReLU
        out = _tree_max([act[g * bn:(g + 1) * bn] for g in range(gs)])    # goodmax over GS
        if resnet_flags[l]:
            out = out + x                                                 # shape-gated resnet
        x = out                                                           # (BN, HID)

    # ---- mixture heads + DecodeEdge node projections: ONE matmul ------------
    x_aug = jnp.concatenate([x, ones_col], axis=1)                        # (BN, HID+1)
    proj = jnp.dot(x_aug, hw_ref[...], preferred_element_type=jnp.float32)  # (BN, 2*Di+M*OUT)
    v1 = proj[:, :edge_d]                                                 # (BN, Di)
    v2 = proj[:, edge_d:2 * edge_d]                                       # (BN, Di)
    hm = proj[:, 2 * edge_d:2 * edge_d + mix_n * out_dim]                 # (BN, M*OUT)

    # mixture statistics (mean over heads; unbiased var + eps)
    if out_dim == 1:
        mu = jnp.mean(hm, axis=-1, keepdims=True)
        if mix_n == 1:
            std = jnp.ones_like(mu)
        else:
            var = jnp.sum((hm - mu) ** 2, axis=-1, keepdims=True) / (mix_n - 1)
            std = jnp.sqrt(var + VAR_EPS)
    else:
        heads = [hm[:, m * out_dim:(m + 1) * out_dim] for m in range(mix_n)]
        mu = sum(heads) / mix_n
        if mix_n == 1:
            std = jnp.ones_like(mu)
        else:
            var = sum((hh - mu) ** 2 for hh in heads) / (mix_n - 1)
            std = jnp.sqrt(var + VAR_EPS)
    mu_std_ref[...] = jnp.concatenate([mu, std], axis=-1)                 # (BN, 2*OUT)

    # ---- DecodeEdge, emitted transposed for a lane-dense (E, B*N*N) output --
    e_parts = []
    for b in range(batch):
        v1b = v1[b * n:(b + 1) * n]                                       # (N, Di)
        v2b = v2[b * n:(b + 1) * n]                                       # (N, Di)
        eb = jnp.maximum(v1b[:, None, :] * v2b[None, :, :], 0.0)          # (N, N, Di)
        e_parts.append(eb.reshape(n * n, edge_d))
    e_flat = jnp.concatenate(e_parts, axis=0)                             # (B*N*N, Di)
    w3t = w3b_ref[:, :edge_d]                                             # (E, Di)
    b3c = w3b_ref[:, edge_d:edge_d + 1]                                   # (E, 1)
    g_dec_ref[...] = jnp.dot(w3t, e_flat.T,
                             preferred_element_type=jnp.float32) + b3c    # (E, B*N*N)


# --------------------------------------------------------------------------
# One-time weight prepacking (hoisted out of the per-call / jitted path).
# --------------------------------------------------------------------------
def prepack_seminet1_params(params):
    gml_w, gml_b = params["gml_w"], params["gml_b"]
    gs, _, hid = gml_w[0].shape
    layers, resnet_flags = [], []
    for w, b in zip(gml_w, gml_b):
        gs_, c, p = w.shape
        assert gs_ == gs and p == hid and c <= hid, "needs g_feature_n <= int_d"
        wp = jnp.transpose(w, (1, 0, 2)).reshape(c, gs_ * p)             # column = g*P + p
        if c < hid:
            wp = jnp.pad(wp, ((0, hid - c), (0, 0)))                     # zero rows for pad lanes
        bp = b.reshape(1, gs_ * p)                                       # (GS,1,P) -> (1,GS*P)
        layers.append(jnp.concatenate([wp, bp], axis=0))                 # bias folded as last row
        resnet_flags.append(bool(c == p))
    gml_w_aug = jnp.stack(layers).astype(jnp.float32)                    # (L, HID+1, GS*HID)

    m, _, out = params["mix_w"].shape
    mix_w = jnp.transpose(params["mix_w"], (1, 0, 2)).reshape(hid, m * out)
    mix_b = params["mix_b"].reshape(1, m * out)
    di = params["de_w1"].shape[-1]
    heads_w = jnp.concatenate([
        jnp.concatenate([params["de_w1"], params["de_w2"], mix_w], axis=1),
        jnp.concatenate([params["de_b1"], params["de_b2"], mix_b], axis=1),
    ], axis=0).astype(jnp.float32)                                       # (HID+1, 2*Di + M*OUT)

    e = params["de_w3"].shape[-1]
    w3b = jnp.concatenate([jnp.transpose(params["de_w3"]),               # (E, Di)
                           params["de_b3"].reshape(e, 1)], axis=1).astype(jnp.float32)  # (E, Di+1)

    return {
        "gml_w_aug": gml_w_aug,
        "heads_w": heads_w,
        "w3b": w3b,
        "resnet_flags": tuple(resnet_flags),
        "dims": {"hid": hid, "mix_n": m, "out_dim": out, "edge_d": di, "edge_out": e},
    }


# --------------------------------------------------------------------------
# SemiNet1.forward (eval mode) wrapper: one fused pallas_call, 5 operands.
# --------------------------------------------------------------------------
def seminet1_forward(packed, adj, vect_feat, input_mask, input_idx, adj_oh):
    del input_mask, input_idx  # only used by input_batchnorm / training path (both off)
    b, gs, n, _ = adj.shape
    f_n = vect_feat.shape[-1]
    d = packed["dims"]
    hid, mix_n, out_dim = d["hid"], d["mix_n"], d["out_dim"]
    edge_d, edge_out = d["edge_d"], d["edge_out"]
    layer_n = packed["gml_w_aug"].shape[0]
    bn = b * n
    kn = gs * b * n

    kernel = functools.partial(
        _seminet1_kernel, batch=b, n=n, gs=gs, f_n=f_n, hid=hid,
        layer_n=layer_n, mix_n=mix_n, out_dim=out_dim, edge_d=edge_d,
        resnet_flags=packed["resnet_flags"])

    mu_std, g_dec_t = pl.pallas_call(
        kernel,
        out_shape=(
            jax.ShapeDtypeStruct((bn, 2 * out_dim), jnp.float32),         # packed mu|std
            jax.ShapeDtypeStruct((edge_out, bn * n), jnp.float32),        # transposed edge decode
        ),
        scratch_shapes=[pltpu.VMEM((kn, kn), jnp.float32)],               # block-diag adjacency
    )(adj.astype(jnp.float32), vect_feat.astype(jnp.float32),
      packed["gml_w_aug"], packed["heads_w"], packed["w3b"])

    mu_std = mu_std.reshape(b, n, 2 * out_dim)
    mu = mu_std[..., :out_dim]
    std = mu_std[..., out_dim:]
    g_decode = jnp.transpose(g_dec_t.reshape(edge_out, b, n, n), (1, 2, 3, 0))  # (B,N,N,E)
    g_in = jnp.transpose(adj_oh, (0, 2, 3, 1))                            # adj_oh.permute(0,2,3,1)
    return {"mu": mu, "std": std, "g_in": g_in, "g_decode": g_decode}

# TODO(synk): training-mode random-subset mixing (host-side numpy RNG selecting one
# head per batch element), MaskedBatchNorm1d (input_batchnorm=True), and any
# input_mask handling are not implemented; eval path only. DecodeEdge is a
# reconstruction of respredict's module.


if __name__ == "__main__":
    B, N, F_N = 2, 16, 16           # batch, MAX_N nodes, node feature dim
    GS = 4                          # adjacency relation channels
    HID, LAYER_N = 32, 3            # int_d, layer_n
    MIX_N, OUT_DIM = 5, 1
    EDGE_INT_D, EDGE_OUT = 32, 4

    key = jax.random.PRNGKey(0)
    keys = iter(jax.random.split(key, 32))

    dims = [F_N] + [HID] * LAYER_N
    params = {
        "gml_w": [jax.random.normal(next(keys), (GS, dims[i], dims[i + 1]), jnp.float32) * 0.1
                  for i in range(LAYER_N)],
        "gml_b": [jax.random.normal(next(keys), (GS, 1, dims[i + 1]), jnp.float32) * 0.01
                  for i in range(LAYER_N)],
        "mix_w": jax.random.normal(next(keys), (MIX_N, HID, OUT_DIM), jnp.float32) * 0.1,
        "mix_b": jax.random.normal(next(keys), (MIX_N, 1, OUT_DIM), jnp.float32) * 0.01,
        "de_w1": jax.random.normal(next(keys), (HID, EDGE_INT_D), jnp.float32) * 0.1,
        "de_b1": jax.random.normal(next(keys), (1, EDGE_INT_D), jnp.float32) * 0.01,
        "de_w2": jax.random.normal(next(keys), (HID, EDGE_INT_D), jnp.float32) * 0.1,
        "de_b2": jax.random.normal(next(keys), (1, EDGE_INT_D), jnp.float32) * 0.01,
        "de_w3": jax.random.normal(next(keys), (EDGE_INT_D, EDGE_OUT), jnp.float32) * 0.1,
        "de_b3": jax.random.normal(next(keys), (1, EDGE_OUT), jnp.float32) * 0.01,
    }

    adj = (jax.random.uniform(next(keys), (B, GS, N, N)) > 0.7).astype(jnp.float32)
    vect_feat = jax.random.normal(next(keys), (B, N, F_N), jnp.float32)
    input_mask = jnp.ones((B, N), jnp.float32)
    input_idx = jnp.arange(B, dtype=jnp.int32)
    adj_oh = (jax.random.uniform(next(keys), (B, 4, N, N)) > 0.7).astype(jnp.float32)

    packed = prepack_seminet1_params(params)          # one-time, outside the jitted path
    fwd = jax.jit(functools.partial(seminet1_forward, packed))
    out = fwd(adj, vect_feat, input_mask, input_idx, adj_oh)
    out = jax.block_until_ready(out)

    assert out["mu"].shape == (B, N, OUT_DIM)
    assert out["std"].shape == (B, N, OUT_DIM)
    assert out["g_in"].shape == (B, N, N, 4)
    assert out["g_decode"].shape == out["g_in"].shape
    assert not bool(jnp.isnan(out["mu"]).any())
    assert not bool(jnp.isnan(out["std"]).any())
    assert not bool(jnp.isnan(out["g_decode"]).any())
    print("KERNEL_OK")
</pallas_src>

<mosaic_0001>
module attributes {stable_mosaic.version = 11 : i64} {
  func.func @_seminet1_kernel(%arg0: memref<2x4x16x16xf32, #tpu.memory_space<vmem>>, %arg1: memref<2x16x16xf32, #tpu.memory_space<vmem>>, %arg2: memref<3x33x128xf32, #tpu.memory_space<vmem>>, %arg3: memref<33x69xf32, #tpu.memory_space<vmem>>, %arg4: memref<4x33xf32, #tpu.memory_space<vmem>>, %arg5: memref<32x2xf32, #tpu.memory_space<vmem>>, %arg6: memref<4x512xf32, #tpu.memory_space<vmem>>, %arg7: memref<128x128xf32, #tpu.memory_space<vmem>>) attributes {dimension_semantics = [], scalar_prefetch = 0 : i64, scratch_operands = 1 : i64, tpu.core_type = #tpu.core_type<tc>} {
    %cst = arith.constant 0.000000e+00 : f32
    %0 = vector.broadcast %cst : f32 to vector<128x128xf32>
    %c0 = arith.constant 0 : index
    %c0_0 = arith.constant 0 : index
    %1 = vector.load %arg7[%c0, %c0_0] : memref<128x128xf32, #tpu.memory_space<vmem>>, vector<128x128xf32>
    tpu.vector_store %arg7[%c0, %c0_0], %0 {strides = array<i32>} : memref<128x128xf32, #tpu.memory_space<vmem>>, vector<128x128xf32>,
    %c0_1 = arith.constant 0 : index
    %c0_2 = arith.constant 0 : index
    %c0_3 = arith.constant 0 : index
    %c0_4 = arith.constant 0 : index
    %2 = vector.load %arg0[%c0_1, %c0_2, %c0_3, %c0_4] : memref<2x4x16x16xf32, #tpu.memory_space<vmem>>, vector<1x1x16x16xf32>
    %3 = vector.shape_cast %2 : vector<1x1x16x16xf32> to vector<16x16xf32>
    %c0_5 = arith.constant 0 : index
    %c0_6 = arith.constant 0 : index
    %4 = vector.load %arg7[%c0_5, %c0_6] : memref<128x128xf32, #tpu.memory_space<vmem>>, vector<16x16xf32>
    tpu.vector_store %arg7[%c0_5, %c0_6], %3 {strides = array<i32>} : memref<128x128xf32, #tpu.memory_space<vmem>>, vector<16x16xf32>,
    %c1 = arith.constant 1 : index
    %c0_7 = arith.constant 0 : index
    %c0_8 = arith.constant 0 : index
    %c0_9 = arith.constant 0 : index
    %5 = vector.load %arg0[%c1, %c0_7, %c0_8, %c0_9] : memref<2x4x16x16xf32, #tpu.memory_space<vmem>>, vector<1x1x16x16xf32>
    %6 = vector.shape_cast %5 : vector<1x1x16x16xf32> to vector<16x16xf32>
    %c16 = arith.constant 16 : index
    %c16_10 = arith.constant 16 : index
    %7 = vector.load %arg7[%c16, %c16_10] : memref<128x128xf32, #tpu.memory_space<vmem>>, vector<16x16xf32>
    tpu.vector_store %arg7[%c16, %c16_10], %6 {strides = array<i32>} : memref<128x128xf32, #tpu.memory_space<vmem>>, vector<16x16xf32>,
    %c0_11 = arith.constant 0 : index
    %c1_12 = arith.constant 1 : index
    %c0_13 = arith.constant 0 : index
    %c0_14 = arith.constant 0 : index
    %8 = vector.load %arg0[%c0_11, %c1_12, %c0_13, %c0_14] : memref<2x4x16x16xf32, #tpu.memory_space<vmem>>, vector<1x1x16x16xf32>
    %9 = vector.shape_cast %8 : vector<1x1x16x16xf32> to vector<16x16xf32>
    %c32 = arith.constant 32 : index
    %c32_15 = arith.constant 32 : index
    %10 = vector.load %arg7[%c32, %c32_15] : memref<128x128xf32, #tpu.memory_space<vmem>>, vector<16x16xf32>
    tpu.vector_store %arg7[%c32, %c32_15], %9 {strides = array<i32>} : memref<128x128xf32, #tpu.memory_space<vmem>>, vector<16x16xf32>,
    %c1_16 = arith.constant 1 : index
    %c1_17 = arith.constant 1 : index
    %c0_18 = arith.constant 0 : index
    %c0_19 = arith.constant 0 : index
    %11 = vector.load %arg0[%c1_16, %c1_17, %c0_18, %c0_19] : memref<2x4x16x16xf32, #tpu.memory_space<vmem>>, vector<1x1x16x16xf32>
    %12 = vector.shape_cast %11 : vector<1x1x16x16xf32> to vector<16x16xf32>
    %c48 = arith.constant 48 : index
    %c48_20 = arith.constant 48 : index
    %13 = vector.load %arg7[%c48, %c48_20] : memref<128x128xf32, #tpu.memory_space<vmem>>, vector<16x16xf32>
    tpu.vector_store %arg7[%c48, %c48_20], %12 {strides = array<i32>} : memref<128x128xf32, #tpu.memory_space<vmem>>, vector<16x16xf32>,
    %c0_21 = arith.constant 0 : index
    %c2 = arith.constant 2 : index
    %c0_22 = arith.constant 0 : index
    %c0_23 = arith.constant 0 : index
    %14 = vector.load %arg0[%c0_21, %c2, %c0_22, %c0_23] : memref<2x4x16x16xf32, #tpu.memory_space<vmem>>, vector<1x1x16x16xf32>
    %15 = vector.shape_cast %14 : vector<1x1x16x16xf32> to vector<16x16xf32>
    %c64 = arith.constant 64 : index
    %c64_24 = arith.constant 64 : index
    %16 = vector.load %arg7[%c64, %c64_24] : memref<128x128xf32, #tpu.memory_space<vmem>>, vector<16x16xf32>
    tpu.vector_store %arg7[%c64, %c64_24], %15 {strides = array<i32>} : memref<128x128xf32, #tpu.memory_space<vmem>>, vector<16x16xf32>,
    %c1_25 = arith.constant 1 : index
    %c2_26 = arith.constant 2 : index
    %c0_27 = arith.constant 0 : index
    %c0_28 = arith.constant 0 : index
    %17 = vector.load %arg0[%c1_25, %c2_26, %c0_27, %c0_28] : memref<2x4x16x16xf32, #tpu.memory_space<vmem>>, vector<1x1x16x16xf32>
    %18 = vector.shape_cast %17 : vector<1x1x16x16xf32> to vector<16x16xf32>
    %c80 = arith.constant 80 : index
    %c80_29 = arith.constant 80 : index
    %19 = vector.load %arg7[%c80, %c80_29] : memref<128x128xf32, #tpu.memory_space<vmem>>, vector<16x16xf32>
    tpu.vector_store %arg7[%c80, %c80_29], %18 {strides = array<i32>} : memref<128x128xf32, #tpu.memory_space<vmem>>, vector<16x16xf32>,
    %c0_30 = arith.constant 0 : index
    %c3 = arith.constant 3 : index
    %c0_31 = arith.constant 0 : index
    %c0_32 = arith.constant 0 : index
    %20 = vector.load %arg0[%c0_30, %c3, %c0_31, %c0_32] : memref<2x4x16x16xf32, #tpu.memory_space<vmem>>, vector<1x1x16x16xf32>
    %21 = vector.shape_cast %20 : vector<1x1x16x16xf32> to vector<16x16xf32>
    %c96 = arith.constant 96 : index
    %c96_33 = arith.constant 96 : index
    %22 = vector.load %arg7[%c96, %c96_33] : memref<128x128xf32, #tpu.memory_space<vmem>>, vector<16x16xf32>
    tpu.vector_store %arg7[%c96, %c96_33], %21 {strides = array<i32>} : memref<128x128xf32, #tpu.memory_space<vmem>>, vector<16x16xf32>,
    %c1_34 = arith.constant 1 : index
    %c3_35 = arith.constant 3 : index
    %c0_36 = arith.constant 0 : index
    %c0_37 = arith.constant 0 : index
    %23 = vector.load %arg0[%c1_34, %c3_35, %c0_36, %c0_37] : memref<2x4x16x16xf32, #tpu.memory_space<vmem>>, vector<1x1x16x16xf32>
    %24 = vector.shape_cast %23 : vector<1x1x16x16xf32> to vector<16x16xf32>
    %c112 = arith.constant 112 : index
    %c112_38 = arith.constant 112 : index
    %25 = vector.load %arg7[%c112, %c112_38] : memref<128x128xf32, #tpu.memory_space<vmem>>, vector<16x16xf32>
    tpu.vector_store %arg7[%c112, %c112_38], %24 {strides = array<i32>} : memref<128x128xf32, #tpu.memory_space<vmem>>, vector<16x16xf32>,
    %c0_39 = arith.constant 0 : index
    %c0_40 = arith.constant 0 : index
    %26 = vector.load %arg7[%c0_39, %c0_40] : memref<128x128xf32, #tpu.memory_space<vmem>>, vector<128x128xf32>
    %c0_41 = arith.constant 0 : index
    %c0_42 = arith.constant 0 : index
    %c0_43 = arith.constant 0 : index
    %27 = vector.load %arg1[%c0_41, %c0_42, %c0_43] : memref<2x16x16xf32, #tpu.memory_space<vmem>>, vector<2x16x16xf32>
    %28 = vector.shape_cast %27 : vector<2x16x16xf32> to vector<32x16xf32>
    %cst_44 = arith.constant 0.000000e+00 : f32
    %29 = vector.broadcast %cst_44 : f32 to vector<32x16xf32>
    %30 = tpu.concatenate %28, %29 in 1 : vector<32x16xf32>, vector<32x16xf32> -> vector<32x32xf32>
    %cst_45 = arith.constant 1.000000e+00 : f32
    %31 = vector.broadcast %cst_45 : f32 to vector<32x1xf32>
    %32 = tpu.concatenate %30, %31 in 1 : vector<32x32xf32>, vector<32x1xf32> -> vector<32x33xf32>
    %c0_46 = arith.constant 0 : index
    %c0_47 = arith.constant 0 : index
    %c0_48 = arith.constant 0 : index
    %33 = vector.load %arg2[%c0_46, %c0_47, %c0_48] : memref<3x33x128xf32, #tpu.memory_space<vmem>>, vector<1x33x128xf32>
    %34 = vector.shape_cast %33 : vector<1x33x128xf32> to vector<33x128xf32>
    %cst_49 = arith.constant dense<0.000000e+00> : vector<32x128xf32>
    %35 = tpu.matmul %32, %34, %cst_49 {dimension_numbers = #tpu.dot_dimension_numbers<[1], [0], [0], [1], [0, 0, 1, 1], [], []>} : vector<32x33xf32>, vector<33x128xf32>, vector<32x128xf32> -> vector<32x128xf32>
    %36 = vector.extract_strided_slice %35 {offsets = [0, 0], sizes = [32, 32], strides = [1, 1]} : vector<32x128xf32> to vector<32x32xf32>
    %37 = vector.extract_strided_slice %35 {offsets = [0, 32], sizes = [32, 32], strides = [1, 1]} : vector<32x128xf32> to vector<32x32xf32>
    %38 = vector.extract_strided_slice %35 {offsets = [0, 64], sizes = [32, 32], strides = [1, 1]} : vector<32x128xf32> to vector<32x32xf32>
    %39 = vector.extract_strided_slice %35 {offsets = [0, 96], sizes = [32, 32], strides = [1, 1]} : vector<32x128xf32> to vector<32x32xf32>
    %40 = tpu.concatenate %36, %37, %38, %39 in 0 : vector<32x32xf32>, vector<32x32xf32>, vector<32x32xf32>, vector<32x32xf32> -> vector<128x32xf32>
    %cst_50 = arith.constant dense<0.000000e+00> : vector<128x32xf32>
    %41 = tpu.matmul %26, %40, %cst_50 {dimension_numbers = #tpu.dot_dimension_numbers<[1], [0], [0], [1], [0, 0, 1, 1], [], []>} : vector<128x128xf32>, vector<128x32xf32>, vector<128x32xf32> -> vector<128x32xf32>
    %cst_51 = arith.constant 0.00999999977 : f32
    %42 = vector.broadcast %cst_51 : f32 to vector<128x32xf32>
    %43 = arith.mulf %42, %41 : vector<128x32xf32>
    %44 = arith.maximumf %41, %43 : vector<128x32xf32>
    %45 = vector.extract_strided_slice %44 {offsets = [0, 0], sizes = [32, 32], strides = [1, 1]} : vector<128x32xf32> to vector<32x32xf32>
    %46 = vector.extract_strided_slice %44 {offsets = [32, 0], sizes = [32, 32], strides = [1, 1]} : vector<128x32xf32> to vector<32x32xf32>
    %47 = vector.extract_strided_slice %44 {offsets = [64, 0], sizes = [32, 32], strides = [1, 1]} : vector<128x32xf32> to vector<32x32xf32>
    %48 = vector.extract_strided_slice %44 {offsets = [96, 0], sizes = [32, 32], strides = [1, 1]} : vector<128x32xf32> to vector<32x32xf32>
    %49 = arith.maximumf %45, %46 : vector<32x32xf32>
    %50 = arith.maximumf %47, %48 : vector<32x32xf32>
    %51 = arith.maximumf %49, %50 : vector<32x32xf32>
    %52 = tpu.concatenate %51, %31 in 1 : vector<32x32xf32>, vector<32x1xf32> -> vector<32x33xf32>
    %c1_52 = arith.constant 1 : index
    %c0_53 = arith.constant 0 : index
    %c0_54 = arith.constant 0 : index
    %53 = vector.load %arg2[%c1_52, %c0_53, %c0_54] : memref<3x33x128xf32, #tpu.memory_space<vmem>>, vector<1x33x128xf32>
    %54 = vector.shape_cast %53 : vector<1x33x128xf32> to vector<33x128xf32>
    %cst_55 = arith.constant dense<0.000000e+00> : vector<32x128xf32>
    %55 = tpu.matmul %52, %54, %cst_55 {dimension_numbers = #tpu.dot_dimension_numbers<[1], [0], [0], [1], [0, 0, 1, 1], [], []>} : vector<32x33xf32>, vector<33x128xf32>, vector<32x128xf32> -> vector<32x128xf32>
    %56 = vector.extract_strided_slice %55 {offsets = [0, 0], sizes = [32, 32], strides = [1, 1]} : vector<32x128xf32> to vector<32x32xf32>
    %57 = vector.extract_strided_slice %55 {offsets = [0, 32], sizes = [32, 32], strides = [1, 1]} : vector<32x128xf32> to vector<32x32xf32>
    %58 = vector.extract_strided_slice %55 {offsets = [0, 64], sizes = [32, 32], strides = [1, 1]} : vector<32x128xf32> to vector<32x32xf32>
    %59 = vector.extract_strided_slice %55 {offsets = [0, 96], sizes = [32, 32], strides = [1, 1]} : vector<32x128xf32> to vector<32x32xf32>
    %60 = tpu.concatenate %56, %57, %58, %59 in 0 : vector<32x32xf32>, vector<32x32xf32>, vector<32x32xf32>, vector<32x32xf32> -> vector<128x32xf32>
    %cst_56 = arith.constant dense<0.000000e+00> : vector<128x32xf32>
    %61 = tpu.matmul %26, %60, %cst_56 {dimension_numbers = #tpu.dot_dimension_numbers<[1], [0], [0], [1], [0, 0, 1, 1], [], []>} : vector<128x128xf32>, vector<128x32xf32>, vector<128x32xf32> -> vector<128x32xf32>
    %cst_57 = arith.constant 0.00999999977 : f32
    %62 = vector.broadcast %cst_57 : f32 to vector<128x32xf32>
    %63 = arith.mulf %62, %61 : vector<128x32xf32>
    %64 = arith.maximumf %61, %63 : vector<128x32xf32>
    %65 = vector.extract_strided_slice %64 {offsets = [0, 0], sizes = [32, 32], strides = [1, 1]} : vector<128x32xf32> to vector<32x32xf32>
    %66 = vector.extract_strided_slice %64 {offsets = [32, 0], sizes = [32, 32], strides = [1, 1]} : vector<128x32xf32> to vector<32x32xf32>
    %67 = vector.extract_strided_slice %64 {offsets = [64, 0], sizes = [32, 32], strides = [1, 1]} : vector<128x32xf32> to vector<32x32xf32>
    %68 = vector.extract_strided_slice %64 {offsets = [96, 0], sizes = [32, 32], strides = [1, 1]} : vector<128x32xf32> to vector<32x32xf32>
    %69 = arith.maximumf %65, %66 : vector<32x32xf32>
    %70 = arith.maximumf %67, %68 : vector<32x32xf32>
    %71 = arith.maximumf %69, %70 : vector<32x32xf32>
    %72 = arith.addf %71, %51 : vector<32x32xf32>
    %73 = tpu.concatenate %72, %31 in 1 : vector<32x32xf32>, vector<32x1xf32> -> vector<32x33xf32>
    %c2_58 = arith.constant 2 : index
    %c0_59 = arith.constant 0 : index
    %c0_60 = arith.constant 0 : index
    %74 = vector.load %arg2[%c2_58, %c0_59, %c0_60] : memref<3x33x128xf32, #tpu.memory_space<vmem>>, vector<1x33x128xf32>
    %75 = vector.shape_cast %74 : vector<1x33x128xf32> to vector<33x128xf32>
    %cst_61 = arith.constant dense<0.000000e+00> : vector<32x128xf32>
    %76 = tpu.matmul %73, %75, %cst_61 {dimension_numbers = #tpu.dot_dimension_numbers<[1], [0], [0], [1], [0, 0, 1, 1], [], []>} : vector<32x33xf32>, vector<33x128xf32>, vector<32x128xf32> -> vector<32x128xf32>
    %77 = vector.extract_strided_slice %76 {offsets = [0, 0], sizes = [32, 32], strides = [1, 1]} : vector<32x128xf32> to vector<32x32xf32>
    %78 = vector.extract_strided_slice %76 {offsets = [0, 32], sizes = [32, 32], strides = [1, 1]} : vector<32x128xf32> to vector<32x32xf32>
    %79 = vector.extract_strided_slice %76 {offsets = [0, 64], sizes = [32, 32], strides = [1, 1]} : vector<32x128xf32> to vector<32x32xf32>
    %80 = vector.extract_strided_slice %76 {offsets = [0, 96], sizes = [32, 32], strides = [1, 1]} : vector<32x128xf32> to vector<32x32xf32>
    %81 = tpu.concatenate %77, %78, %79, %80 in 0 : vector<32x32xf32>, vector<32x32xf32>, vector<32x32xf32>, vector<32x32xf32> -> vector<128x32xf32>
    %cst_62 = arith.constant dense<0.000000e+00> : vector<128x32xf32>
    %82 = tpu.matmul %26, %81, %cst_62 {dimension_numbers = #tpu.dot_dimension_numbers<[1], [0], [0], [1], [0, 0, 1, 1], [], []>} : vector<128x128xf32>, vector<128x32xf32>, vector<128x32xf32> -> vector<128x32xf32>
    %cst_63 = arith.constant 0.00999999977 : f32
    %83 = vector.broadcast %cst_63 : f32 to vector<128x32xf32>
    %84 = arith.mulf %83, %82 : vector<128x32xf32>
    %85 = arith.maximumf %82, %84 : vector<128x32xf32>
    %86 = vector.extract_strided_slice %85 {offsets = [0, 0], sizes = [32, 32], strides = [1, 1]} : vector<128x32xf32> to vector<32x32xf32>
    %87 = vector.extract_strided_slice %85 {offsets = [32, 0], sizes = [32, 32], strides = [1, 1]} : vector<128x32xf32> to vector<32x32xf32>
    %88 = vector.extract_strided_slice %85 {offsets = [64, 0], sizes = [32, 32], strides = [1, 1]} : vector<128x32xf32> to vector<32x32xf32>
    %89 = vector.extract_strided_slice %85 {offsets = [96, 0], sizes = [32, 32], strides = [1, 1]} : vector<128x32xf32> to vector<32x32xf32>
    %90 = arith.maximumf %86, %87 : vector<32x32xf32>
    %91 = arith.maximumf %88, %89 : vector<32x32xf32>
    %92 = arith.maximumf %90, %91 : vector<32x32xf32>
    %93 = arith.addf %92, %72 : vector<32x32xf32>
    %94 = tpu.concatenate %93, %31 in 1 : vector<32x32xf32>, vector<32x1xf32> -> vector<32x33xf32>
    %c0_64 = arith.constant 0 : index
    %c0_65 = arith.constant 0 : index
    %95 = vector.load %arg3[%c0_64, %c0_65] : memref<33x69xf32, #tpu.memory_space<vmem>>, vector<33x69xf32>
    %cst_66 = arith.constant dense<0.000000e+00> : vector<32x69xf32>
    %96 = tpu.matmul %94, %95, %cst_66 {dimension_numbers = #tpu.dot_dimension_numbers<[1], [0], [0], [1], [0, 0, 1, 1], [], []>} : vector<32x33xf32>, vector<33x69xf32>, vector<32x69xf32> -> vector<32x69xf32>
    %97 = vector.extract_strided_slice %96 {offsets = [0, 0], sizes = [32, 32], strides = [1, 1]} : vector<32x69xf32> to vector<32x32xf32>
    %98 = vector.extract_strided_slice %96 {offsets = [0, 32], sizes = [32, 32], strides = [1, 1]} : vector<32x69xf32> to vector<32x32xf32>
    %99 = vector.extract_strided_slice %96 {offsets = [0, 64], sizes = [32, 5], strides = [1, 1]} : vector<32x69xf32> to vector<32x5xf32>
    %cst_67 = arith.constant dense<0.000000e+00> : vector<32xf32>
    %100 = vector.multi_reduction <add>, %99, %cst_67 [1] : vector<32x5xf32> to vector<32xf32>
    %101 = vector.shape_cast %100 : vector<32xf32> to vector<32x1xf32>
    %cst_68 = arith.constant 5.000000e+00 : f32
    %102 = vector.broadcast %cst_68 : f32 to vector<32x1xf32>
    %103 = arith.divf %101, %102 : vector<32x1xf32>
    %104 = vector.broadcast %103 : vector<32x1xf32> to vector<32x5xf32>
    %105 = arith.subf %99, %104 : vector<32x5xf32>
    %106 = arith.mulf %105, %105 : vector<32x5xf32>
    %cst_69 = arith.constant dense<0.000000e+00> : vector<32xf32>
    %107 = vector.multi_reduction <add>, %106, %cst_69 [1] : vector<32x5xf32> to vector<32xf32>
    %108 = vector.shape_cast %107 : vector<32xf32> to vector<32x1xf32>
    %cst_70 = arith.constant 4.000000e+00 : f32
    %109 = vector.broadcast %cst_70 : f32 to vector<32x1xf32>
    %110 = arith.divf %108, %109 : vector<32x1xf32>
    %cst_71 = arith.constant 9.99999974E-6 : f32
    %111 = vector.broadcast %cst_71 : f32 to vector<32x1xf32>
    %112 = arith.addf %110, %111 : vector<32x1xf32>
    %113 = math.sqrt %112 : vector<32x1xf32>
    %114 = tpu.concatenate %103, %113 in 1 : vector<32x1xf32>, vector<32x1xf32> -> vector<32x2xf32>
    %c0_72 = arith.constant 0 : index
    %c0_73 = arith.constant 0 : index
    %115 = vector.load %arg5[%c0_72, %c0_73] : memref<32x2xf32, #tpu.memory_space<vmem>>, vector<32x2xf32>
    tpu.vector_store %arg5[%c0_72, %c0_73], %114 {strides = array<i32>} : memref<32x2xf32, #tpu.memory_space<vmem>>, vector<32x2xf32>,
    %116 = vector.extract_strided_slice %97 {offsets = [0, 0], sizes = [16, 32], strides = [1, 1]} : vector<32x32xf32> to vector<16x32xf32>
    %117 = vector.extract_strided_slice %98 {offsets = [0, 0], sizes = [16, 32], strides = [1, 1]} : vector<32x32xf32> to vector<16x32xf32>
    %118 = vector.shape_cast %116 : vector<16x32xf32> to vector<16x1x32xf32>
    %119 = vector.shape_cast %117 : vector<16x32xf32> to vector<1x16x32xf32>
    %120 = vector.broadcast %118 : vector<16x1x32xf32> to vector<16x16x32xf32>
    %121 = vector.broadcast %119 : vector<1x16x32xf32> to vector<16x16x32xf32>
    %122 = arith.mulf %120, %121 : vector<16x16x32xf32>
    %cst_74 = arith.constant 0.000000e+00 : f32
    %123 = vector.broadcast %cst_74 : f32 to vector<16x16x32xf32>
    %124 = arith.maximumf %122, %123 : vector<16x16x32xf32>
    %125 = vector.shape_cast %124 : vector<16x16x32xf32> to vector<256x32xf32>
    %126 = vector.extract_strided_slice %97 {offsets = [16, 0], sizes = [16, 32], strides = [1, 1]} : vector<32x32xf32> to vector<16x32xf32>
    %127 = vector.extract_strided_slice %98 {offsets = [16, 0], sizes = [16, 32], strides = [1, 1]} : vector<32x32xf32> to vector<16x32xf32>
    %128 = vector.shape_cast %126 : vector<16x32xf32> to vector<16x1x32xf32>
    %129 = vector.shape_cast %127 : vector<16x32xf32> to vector<1x16x32xf32>
    %130 = vector.broadcast %128 : vector<16x1x32xf32> to vector<16x16x32xf32>
    %131 = vector.broadcast %129 : vector<1x16x32xf32> to vector<16x16x32xf32>
    %132 = arith.mulf %130, %131 : vector<16x16x32xf32>
    %cst_75 = arith.constant 0.000000e+00 : f32
    %133 = vector.broadcast %cst_75 : f32 to vector<16x16x32xf32>
    %134 = arith.maximumf %132, %133 : vector<16x16x32xf32>
    %135 = vector.shape_cast %134 : vector<16x16x32xf32> to vector<256x32xf32>
    %136 = tpu.concatenate %125, %135 in 0 : vector<256x32xf32>, vector<256x32xf32> -> vector<512x32xf32>
    %c0_76 = arith.constant 0 : index
    %c0_77 = arith.constant 0 : index
    %137 = vector.load %arg4[%c0_76, %c0_77] : memref<4x33xf32, #tpu.memory_space<vmem>>, vector<4x32xf32>
    %c0_78 = arith.constant 0 : index
    %c32_79 = arith.constant 32 : index
    %138 = vector.load %arg4[%c0_78, %c32_79] : memref<4x33xf32, #tpu.memory_space<vmem>>, vector<4x1xf32>
    %139 = tpu.transpose %136, [1, 0] : vector<512x32xf32> -> vector<32x512xf32>
    %cst_80 = arith.constant dense<0.000000e+00> : vector<4x512xf32>
    %140 = tpu.matmul %137, %139, %cst_80 {dimension_numbers = #tpu.dot_dimension_numbers<[1], [0], [0], [1], [0, 0, 1, 1], [], []>} : vector<4x32xf32>, vector<32x512xf32>, vector<4x512xf32> -> vector<4x512xf32>
    %141 = vector.broadcast %138 : vector<4x1xf32> to vector<4x512xf32>
    %142 = arith.addf %140, %141 : vector<4x512xf32>
    %c0_81 = arith.constant 0 : index
    %c0_82 = arith.constant 0 : index
    %143 = vector.load %arg6[%c0_81, %c0_82] : memref<4x512xf32, #tpu.memory_space<vmem>>, vector<4x512xf32>
    tpu.vector_store %arg6[%c0_81, %c0_82], %142 {strides = array<i32>} : memref<4x512xf32, #tpu.memory_space<vmem>>, vector<4x512xf32>,
    return
  }
}

</mosaic_0001>

<bundles_post_ra>
// kernel: seminet1_forward.1
= control target key start
LH: loop header
LB: loop body
LE: loop exit
PB: predicated region body
PF: predicated region fallthrough
CT: control target
= control target key end

     0   :  { %12 = vsyncpa [#allocation4], 0  ;;  %s4000_s0 = inlined_call_operand.hbm [shape: f32[2,4,16,16], index: 0, kind: input, shape index: {}]   ;;  %s4001_s1 = inlined_call_operand.hbm [shape: f32[2,16,16], index: 1, kind: input, shape index: {}]   ;;  %s4002_s2 = inlined_call_operand.hbm [shape: f32[3,33,128], index: 2, kind: input, shape index: {}]   ;;  %s4003_s3 = inlined_call_operand.hbm [shape: f32[33,69], index: 3, kind: input, shape index: {}]   ;;  %s4004_s4 = inlined_call_operand.vmem [shape: f32[4,33], index: 4, kind: input, shape index: {}]   ;;  %s4005_s5 = inlined_call_operand.vmem [shape: f32[32,2], index: 5, kind: output, shape index: {0}]   ;;  %s4006_s6 = inlined_call_operand.vmem [shape: f32[4,512], index: 6, kind: output, shape index: {1}]  }
   0x1   :  { %13 = vsyncpa [#allocation6], 0 }
   0x2   :  { %14 = vsyncpa [#allocation9], 0  ;;  %s3284_s21 = smov [#allocation5]   ;;  %s3285_s23 = smov [#allocation3]  }
   0x3   :  { %s32_s22 = sshll.u32 %s3284_s21, 4  ;;  %s20_s24 = sshll.u32 %s3285_s23, 4  ;;  %s33_s22 = int_to_ptr.vmem [resolvable:$true] %s32_s22  ;;  %s3335_s24 = int_to_ptr.vmem [resolvable:$true] %s20_s24 }
   0x4   :  { %s3190_s27 = scalar_lea.hbm %s4001_s1, 512 }
   0x5   :  { %p3191_p0 = scmp.ne.s32.totalorder %s4001_s1, %s3190_s27  ;;  %p3194_p1 = scmp.lt.u32.totalorder %s3190_s27, %s4001_s1 }
   0x7   :  { %p3196_p2 = pnand %p3194_p1, %p3191_p0 }
   0x9   :  { %3199 = shalt.err (!%p3196_p2)
}
   0xa   :  { %s3200_s8 = scalar_lea.vmem %s33_s22, 512  ;;  %p3205_p4 = scmp.lt.s32.totalorder %s33_s22, %s33_s22 }
   0xb   :  { %p3201_p3 = scmp.ne.s32.totalorder %s33_s22, %s3200_s8  ;;  %p3206_p5 = scmp.lt.s32.totalorder %s3200_s8, %s3200_s8 }
   0xd   :  { %p3207_p6 = por %p3206_p5, %p3205_p4 }
   0xf   :  { %p3208_p7 = pnand %p3207_p6, %p3201_p3 }
  0x11   :  { %3211 = shalt.err (!%p3208_p7)
}
  0x12   :  { %s3286_s9 = smov 128   ;;  %s3287_s10 = smov 8  }
  0x13   :  { %38 = dma.hbm_to_vmem [thread:$0]  %s4001_s1, 512, %s33_s22, [#allocation6], %s3286_s9, %s3286_s9, %s3287_s10  }
  0x14   :  { %s3212_s15 = scalar_lea.hbm %s4000_s0, 2048 }
  0x15   :  { %p3213_p8 = scmp.ne.s32.totalorder %s4000_s0, %s3212_s15  ;;  %p3216_p9 = scmp.lt.u32.totalorder %s3212_s15, %s4000_s0 }
  0x17   :  { %p3218_p10 = pnand %p3216_p9, %p3213_p8 }
  0x19   :  { %3221 = shalt.err (!%p3218_p10)
}
  0x1a   :  { %s3222_s20 = scalar_lea.vmem %s3335_s24, 2048  ;;  %p3227_p12 = scmp.lt.s32.totalorder %s3335_s24, %s3335_s24 }
  0x1b   :  { %p3223_p11 = scmp.ne.s32.totalorder %s3335_s24, %s3222_s20  ;;  %p3228_p13 = scmp.lt.s32.totalorder %s3222_s20, %s3222_s20 }
  0x1d   :  { %p3229_p0 = por %p3228_p13, %p3227_p12 }
  0x1f   :  { %p3230_p1 = pnand %p3229_p0, %p3223_p11 }
  0x21   :  { %3233 = shalt.err (!%p3230_p1)
}
  0x22   :  { %26 = dma.hbm_to_vmem [thread:$0]  %s4000_s0, 2048, %s3335_s24, [#allocation4], %s3286_s9, %s3286_s9, %s3287_s10  }
  0x23   :  { %s3288_s22 = smov [#allocation7]   ;;  %s3289_s25 = smov [#allocation8]  }
  0x24   :  { %s44_s23 = sshll.u32 %s3288_s22, 4  ;;  %s56_s26 = sshll.u32 %s3289_s25, 4  ;;  %s45_s23 = int_to_ptr.vmem [resolvable:$true] %s44_s23  ;;  %s3372_s26 = int_to_ptr.vmem [resolvable:$true] %s56_s26 }
  0x25   :  { %s3234_s29 = scalar_lea.hbm %s4002_s2, 1920 }
  0x26   :  { %p3235_p2 = scmp.ne.s32.totalorder %s4002_s2, %s3234_s29  ;;  %p3238_p3 = scmp.lt.u32.totalorder %s3234_s29, %s4002_s2 }
  0x28   :  { %p3240_p4 = pnand %p3238_p3, %p3235_p2 }
  0x2a   :  { %3243 = shalt.err (!%p3240_p4)
}
  0x2b   :  { %s3244_s0 = scalar_lea.vmem %s45_s23, 1920  ;;  %p3249_p6 = scmp.lt.s32.totalorder %s45_s23, %s45_s23 }
  0x2c   :  { %p3245_p5 = scmp.ne.s32.totalorder %s45_s23, %s3244_s0  ;;  %p3250_p7 = scmp.lt.s32.totalorder %s3244_s0, %s3244_s0 }
  0x2e   :  { %p3251_p8 = por %p3250_p7, %p3249_p6 }
  0x30   :  { %p3252_p9 = pnand %p3251_p8, %p3245_p5 }
  0x32   :  { %3255 = shalt.err (!%p3252_p9)
}
  0x33   :  { %50 = dma.hbm_to_vmem [thread:$0]  %s4002_s2, 1920, %s45_s23, [#allocation6], %s3286_s9, %s3286_s9, %s3287_s10  }
  0x34   :  { %s3256_s15 = scalar_lea.hbm %s4003_s3, 640 }
  0x35   :  { %p3257_p10 = scmp.ne.s32.totalorder %s4003_s3, %s3256_s15  ;;  %p3260_p11 = scmp.lt.u32.totalorder %s3256_s15, %s4003_s3 }
  0x37   :  { %p3262_p12 = pnand %p3260_p11, %p3257_p10 }
  0x39   :  { %3265 = shalt.err (!%p3262_p12)
}
  0x3a   :  { %s3266_s20 = scalar_lea.vmem %s3372_s26, 640  ;;  %p3271_p0 = scmp.lt.s32.totalorder %s3372_s26, %s3372_s26 }
  0x3b   :  { %p3267_p13 = scmp.ne.s32.totalorder %s3372_s26, %s3266_s20  ;;  %p3272_p1 = scmp.lt.s32.totalorder %s3266_s20, %s3266_s20 }
  0x3d   :  { %p3273_p2 = por %p3272_p1, %p3271_p0 }
  0x3f   :  { %p3274_p3 = pnand %p3273_p2, %p3267_p13 }
  0x41   :  { %3277 = shalt.err (!%p3274_p3)
}
  0x42   :  { %62 = dma.hbm_to_vmem [thread:$0]  %s4003_s3, 640, %s3372_s26, [#allocation9], %s3286_s9, %s3286_s9, %s3287_s10  }
  0x43   :  { %3278 = dma.done.wait [#allocation4], 2048  }
  0x44   :  { %3279 = vsyncadd [#allocation4], 4294965248 }
  0x45   :  { %3280 = dma.done.wait [#allocation6], 2432  }
  0x46   :  { %3281 = vsyncadd [#allocation6], 4294964864 }
  0x47   :  { %3282 = dma.done.wait [#allocation9], 640  }
  0x48   :  { %3283 = vsyncadd [#allocation9], 4294966656  ;;  %v3290_v0 = vmov 0.0   ;;  %v225_v1 = vld [vmem:[#allocation7] sm:$0xff]  ;;  %v226_v2 = vld [vmem:[#allocation7 + $0x8] sm:$0xff]  ;;  %vm95_vm0 = vcmask 130048  }
  0x49   :  { %77 = vst [vmem:[#allocation2] sm:$0xff] %v3290_v0  ;;  %78 = vst [vmem:[#allocation2 + $0x8] sm:$0xff] %v3290_v0  ;;  %v227_v3 = vld [vmem:[#allocation7 + $0x10] sm:$0xff]  ;;  %v2850_v4 = vpack.c.bf16 %v226_v2, %v225_v1  ;;  %v228_v5 = vld [vmem:[#allocation7 + $0x18] sm:$0xff]  ;;  %vm220_vm1 = vcmask 261120   ;;  %vm230_vm2 = vcmask 269312  }
  0x4a   :  { %79 = vst [vmem:[#allocation2 + $0x10] sm:$0xff] %v3290_v0  ;;  %80 = vst [vmem:[#allocation2 + $0x18] sm:$0xff] %v3290_v0  ;;  %v93_v6 = vld [vmem:[#allocation3] sm:$0xff]  ;;  %v2854_v7 = vpack.c.bf16 %v228_v5, %v227_v3  ;;  %v94_v8 = vld [vmem:[#allocation3 + $0x8] sm:$0xff]  ;;  %vm243_vm3 = vcmask 1040384   ;;  %s3291_s3 = smov 64  }
  0x4b   :  { %81 = vst [vmem:[#allocation2 + $0x20] sm:$0xff] %v3290_v0  ;;  %82 = vst [vmem:[#allocation2 + $0x28] sm:$0xff] %v3290_v0  ;;  %v212_v9 = vld [vmem:[#allocation5] sm:$0xff]  ;;  %2851 = vmatprep.subr.bf16.mxu0 %v2850_v4  ;;  %v213_v12 = vld [vmem:[#allocation5 + $0x8] sm:$0xff]  ;;  %s3292_s9 = smov 96   ;;  %s3293_s10 = smov 32  }
  0x4c   :  { %83 = vst [vmem:[#allocation2 + $0x30] sm:$0xff] %v3290_v0  ;;  %84 = vst [vmem:[#allocation2 + $0x38] sm:$0xff] %v3290_v0  ;;  %v216_v10 = vsel %vm95_vm0, %v212_v9, 0.0  ;;  %2853 = vmatpush3.bf16.msra.mxu0 %v2850_v4  ;;  %v214_v13 = vld [vmem:[#allocation5 + $0x10] sm:$0xff]  ;;  %v229_v14 = vld [vmem:[#allocation7 + $0x20] sm:$0x1] }
  0x4d   :  { %85 = vst [vmem:[#allocation2 + $0x40] sm:$0xff] %v3290_v0  ;;  %86 = vst [vmem:[#allocation2 + $0x48] sm:$0xff] %v3290_v0  ;;  %v221_v11 = vsel %vm220_vm1, %v216_v10, 1.0  ;;  %2855 = vmatprep.subr.bf16.mxu0 %v2854_v7  ;;  %v217_v15 = vsel %vm95_vm0, %v213_v12, 0.0  ;;  %v218_v16 = vsel %vm95_vm0, %v214_v13, 0.0  ;;  %v215_v17 = vld [vmem:[#allocation5 + $0x18] sm:$0xff] }
  0x4e   :  { %87 = vst [vmem:[#allocation2 + $0x50] sm:$0xff] %v3290_v0  ;;  %88 = vst [vmem:[#allocation2 + $0x58] sm:$0xff] %v3290_v0  ;;  %2628 = vmatprep.mubr.msk.f32.mxu0 %vm230_vm2, %v221_v11  ;;  %v222_v18 = vsel %vm220_vm1, %v217_v15, 1.0  ;;  %v223_v19 = vsel %vm220_vm1, %v218_v16, 1.0  ;;  %v219_v20 = vsel %vm95_vm0, %v215_v17, 0.0  ;;  %v99_v30 = vld [vmem:[#allocation3 + $0x40] sm:$0xff] }
  0x4f   :  { %89 = vst [vmem:[#allocation2 + $0x60] sm:$0xff] %v3290_v0  ;;  %90 = vst [vmem:[#allocation2 + $0x68] sm:$0xff] %v3290_v0  ;;  %v224_v21 = vsel %vm220_vm1, %v219_v20, 1.0  ;;  %v100_v31 = vld [vmem:[#allocation3 + $0x48] sm:$0xff]  ;;  %s3294_s21 = smov 16   ;;  %v113_v33 = vld [vmem:[#allocation3 + $0x10] sm:$0xff] }
  0x50   :  { %91 = vst [vmem:[#allocation2 + $0x70] sm:$0xff] %v3290_v0  ;;  %92 = vst [vmem:[#allocation2 + $0x78] sm:$0xff] %v3290_v0  ;;  %2857 = vmatpush3.bf16.msra.mxu0 %v2854_v7  ;;  %v114_v34 = vld [vmem:[#allocation3 + $0x18] sm:$0xff]  ;;  %v127_v35 = vld [vmem:[#allocation3 + $0x50] sm:$0xff]  ;;  %s3295_s22 = smov 48   ;;  %s3296_s23 = smov 80  }
  0x51   :  { %96 = vst.msk [vmem:[#allocation2] sm:$0xff] %vm95_vm0, %v93_v6  ;;  %97 = vst.msk [vmem:[#allocation2 + $0x8] sm:$0xff] %vm95_vm0, %v94_v8  ;;  %2626 = vmatprep.subr.msk.mxu0 %vm243_vm3, %v229_v14  ;;  %v128_v36 = vld [vmem:[#allocation3 + $0x58] sm:$0xff]  ;;  %v141_v37 = vld [vmem:[#allocation3 + $0x20] sm:$0xff]  ;;  %s3297_s25 = smov 112   ;;  %vm109_vm4 = vcmask 261248  }
  0x52   :  { %v142_v38 = vld [vmem:[#allocation3 + $0x28] sm:$0xff]  ;;  %v155_v39 = vld [vmem:[#allocation3 + $0x60] sm:$0xff]  ;;  %v169_v41 = vld [vmem:[#allocation3 + $0x30] sm:$0xff]  ;;  %vm123_vm5 = vcmask 392448   ;;  %vm137_vm6 = vcmask 523648   ;;  %vm151_vm7 = vcmask 654848  }
  0x53   :  { %v156_v40 = vld [vmem:[#allocation3 + $0x68] sm:$0xff]  ;;  %v170_v42 = vld [vmem:[#allocation3 + $0x38] sm:$0xff]  ;;  %v183_v43 = vld [vmem:[#allocation3 + $0x70] sm:$0xff]  ;;  %vm165_vm8 = vcmask 786048   ;;  %vm179_vm9 = vcmask 917248   ;;  %vm193_vm10 = vcmask 1048448  }
  0x54   :  { %2627 = vmatpush3.msk.msra.mxu0 %vm243_vm3, %v229_v14  ;;  %v184_v44 = vld [vmem:[#allocation3 + $0x78] sm:$0xff]  ;;  %vm1372_vm11 = vcmask 39936   ;;  %vm3700_vm12 = vmpackc.low %vm220_vm1, %vm220_vm1  ;;  %vm1463_vm13 = vcmask 7168   ;;  %vm1468_vm14 = vcmask 15360  }
  0x55   :  { %2629 = vmatmul.mubr.msk.f32.vlgmr.msra.gmra.mrb[0].mxu0 %vm230_vm2, %v222_v18 }
  0x56   :  { %2631 = vmatprep.mubr.msk.f32.mxu0 %vm230_vm2, %v223_v19 }
  0x58   :  { %v3431_v32 = vld [vmem:[#allocation2] sm:$0xff]  ;;  %v3440_v13 = vld [vmem:[#allocation2 + $0x8] sm:$0xff] }
  0x59   :  { %2632 = vmatmul.mubr.msk.f32.gmra.mrb[2].mxu0 %vm230_vm2, %v224_v21  ;;  %2666 = vmatprep.mubr.f32.mxu1 %v3431_v32 }
 0x128   :  { %v2630_v22 = vpop.f32.mrb[0].mxu0 }
 0x129   :  { %v313_v23 = vpop.f32.mrb[1].mxu0 }
 0x12a   :  { %v3100_v24 = vpack.i.bf16 %v2630_v22, %v313_v23  ;;  %v2858_v25 = vpack.c.bf16 %v2630_v22, %v313_v23 }
 0x12c   :  { %3101 = vrot.lane.b32.xlu1 %v3100_v24, %s3291_s3  ;;  %3091 = vrot.lane.b32.xlu0 %v3100_v24, %s3292_s9  ;;  %v2633_v26 = vpop.f32.mrb[2].mxu0 }
 0x12d   :  { %2859 = vmatprep.subr.bf16.mxu1 %v2858_v25  ;;  %v323_v27 = vpop.f32.mrb[3].mxu0 }
 0x12e   :  { %2861 = vmatpush3.bf16.msra.mxu1 %v2858_v25  ;;  %v3105_v28 = vpack.i.bf16 %v2633_v26, %v323_v27  ;;  %v2862_v29 = vpack.c.bf16 %v2633_v26, %v323_v27 }
 0x130   :  { %3106 = vrot.lane.b32.xlu1 %v3105_v28, %s3291_s3  ;;  %3096 = vrot.lane.b32.xlu0 %v3105_v28, %s3292_s9 }
 0x131   :  { %2863 = vmatprep.subr.bf16.mxu1 %v2862_v29 }
 0x132   :  { %2865 = vmatpush3.bf16.msra.mxu1 %v2862_v29 }
 0x134   :  { %3116 = vrot.lane.b32.xlu1 %v3105_v28, %s3293_s10  ;;  %3111 = vrot.lane.b32.xlu0 %v3100_v24, %s3293_s10 }
 0x138   :  { %103 = vrot.lane.b32.xlu0 %v99_v30, %s3294_s21  ;;  %105 = vrot.lane.b32.xlu1 %v100_v31, %s3294_s21 }
 0x13c   :  { %117 = vrot.lane.b32.xlu0 %v113_v33, %s3293_s10  ;;  %119 = vrot.lane.b32.xlu1 %v114_v34, %s3293_s10 }
 0x140   :  { %131 = vrot.lane.b32.xlu0 %v127_v35, %s3295_s22  ;;  %133 = vrot.lane.b32.xlu1 %v128_v36, %s3295_s22  ;;  %v566_v35 = vld [vmem:[#allocation7 + $0x28] sm:$0xff]  ;;  %v567_v36 = vld [vmem:[#allocation7 + $0x30] sm:$0xff] }
 0x144   :  { %145 = vrot.lane.b32.xlu0 %v141_v37, %s3291_s3  ;;  %147 = vrot.lane.b32.xlu1 %v142_v38, %s3291_s3  ;;  %v2890_v37 = vpack.c.bf16 %v567_v36, %v566_v35  ;;  %v568_v38 = vld [vmem:[#allocation7 + $0x38] sm:$0xff] }
 0x146   :  { %2891 = vmatprep.subr.bf16.mxu0 %v2890_v37 }
 0x147   :  { %2893 = vmatpush3.bf16.msra.mxu0 %v2890_v37 }
 0x148   :  { %159 = vrot.lane.b32.xlu0 %v155_v39, %s3296_s23  ;;  %161 = vrot.lane.b32.xlu1 %v156_v40, %s3296_s23  ;;  %v569_v39 = vld [vmem:[#allocation7 + $0x40] sm:$0xff] }
 0x149   :  { %v2894_v40 = vpack.c.bf16 %v569_v39, %v568_v38 }
 0x14b   :  { %2895 = vmatprep.subr.bf16.mxu0 %v2894_v40 }
 0x14c   :  { %173 = vrot.lane.b32.xlu0 %v169_v41, %s3292_s9  ;;  %175 = vrot.lane.b32.xlu1 %v170_v42, %s3292_s9  ;;  %v570_v41 = vld [vmem:[#allocation7 + $0x48] sm:$0x1] }
 0x14d   :  { %2897 = vmatpush3.bf16.msra.mxu0 %v2894_v40 }
 0x14e   :  { %2698 = vmatprep.subr.msk.mxu0 %vm243_vm3, %v570_v41 }
 0x150   :  { %187 = vrot.lane.b32.xlu0 %v183_v43, %s3297_s25  ;;  %189 = vrot.lane.b32.xlu1 %v184_v44, %s3297_s25 }
 0x151   :  { %2699 = vmatpush3.msk.msra.mxu0 %vm243_vm3, %v570_v41 }
 0x19e   :  { %v3102_v45 = vpop.permute.xlu1 %3101  ;;  %v3092_v46 = vpop.permute.xlu0 %3091 }
 0x19f   :  { %v3094_v47 = vunpack.i.h.bf16 %v3092_v46  ;;  %v3093_v48 = vunpack.i.l.bf16 %v3092_v46  ;;  %v3104_v52 = vunpack.i.h.bf16 %v3102_v45  ;;  %v3103_v53 = vunpack.i.l.bf16 %v3102_v45 }
 0x1a1   :  { %v2866_v49 = vpack.c.bf16 %v3094_v47, %v3093_v48  ;;  %v2874_v59 = vpack.c.bf16 %v3104_v52, %v3103_v53 }
 0x1a2   :  { %v3107_v50 = vpop.permute.xlu1 %3106  ;;  %v3097_v51 = vpop.permute.xlu0 %3096 }
 0x1a3   :  { %v3099_v54 = vunpack.i.h.bf16 %v3097_v51  ;;  %v3098_v55 = vunpack.i.l.bf16 %v3097_v51  ;;  %2867 = vmatprep.subr.bf16.mxu1 %v2866_v49  ;;  %v3109_v60 = vunpack.i.h.bf16 %v3107_v50  ;;  %v3108_v61 = vunpack.i.l.bf16 %v3107_v50 }
 0x1a4   :  { %2869 = vmatpush3.bf16.msra.mxu1 %v2866_v49 }
 0x1a5   :  { %v2870_v56 = vpack.c.bf16 %v3099_v54, %v3098_v55  ;;  %v2878_v0 = vpack.c.bf16 %v3109_v60, %v3108_v61 }
 0x1a6   :  { %v3117_v57 = vpop.permute.xlu1 %3116  ;;  %v3112_v58 = vpop.permute.xlu0 %3111 }
 0x1a7   :  { %2871 = vmatprep.subr.bf16.mxu1 %v2870_v56  ;;  %v3114_v1 = vunpack.i.h.bf16 %v3112_v58  ;;  %v3113_v2 = vunpack.i.l.bf16 %v3112_v58  ;;  %v3119_v5 = vunpack.i.h.bf16 %v3117_v57  ;;  %v3118_v6 = vunpack.i.l.bf16 %v3117_v57 }
 0x1a8   :  { %2873 = vmatpush3.bf16.msra.mxu1 %v2870_v56 }
 0x1a9   :  { %2875 = vmatprep.subr.bf16.mxu1 %v2874_v59  ;;  %v2882_v7 = vpack.c.bf16 %v3114_v1, %v3113_v2  ;;  %v2886_v10 = vpack.c.bf16 %v3119_v5, %v3118_v6 }
 0x1aa   :  { %v104_v62 = vpop.permute.xlu0 %103  ;;  %v106_v63 = vpop.permute.xlu1 %105 }
 0x1ab   :  { %110 = vst.msk [vmem:[#allocation2 + $0x10] sm:$0xff] %vm109_vm4, %v104_v62  ;;  %111 = vst.msk [vmem:[#allocation2 + $0x18] sm:$0xff] %vm109_vm4, %v106_v63 }
 0x1ac   :  { %2877 = vmatpush3.bf16.msra.mxu1 %v2874_v59 }
 0x1ad   :  { %2879 = vmatprep.subr.bf16.mxu1 %v2878_v0 }
 0x1ae   :  { %v118_v3 = vpop.permute.xlu0 %117  ;;  %v120_v4 = vpop.permute.xlu1 %119 }
 0x1af   :  { %124 = vst.msk [vmem:[#allocation2 + $0x20] sm:$0xff] %vm123_vm5, %v118_v3  ;;  %125 = vst.msk [vmem:[#allocation2 + $0x28] sm:$0xff] %vm123_vm5, %v120_v4 }
 0x1b0   :  { %2881 = vmatpush3.bf16.msra.mxu1 %v2878_v0 }
 0x1b1   :  { %2883 = vmatprep.subr.bf16.mxu1 %v2882_v7 }
 0x1b2   :  { %v132_v8 = vpop.permute.xlu0 %131  ;;  %v134_v9 = vpop.permute.xlu1 %133  ;;  %v3442_v14 = vld [vmem:[#allocation2 + $0x10] sm:$0xff]  ;;  %v3446_v17 = vld [vmem:[#allocation2 + $0x18] sm:$0xff] }
 0x1b3   :  { %138 = vst.msk [vmem:[#allocation2 + $0x30] sm:$0xff] %vm137_vm6, %v132_v8  ;;  %139 = vst.msk [vmem:[#allocation2 + $0x38] sm:$0xff] %vm137_vm6, %v134_v9 }
 0x1b4   :  { %2885 = vmatpush3.bf16.msra.mxu1 %v2882_v7 }
 0x1b5   :  { %2887 = vmatprep.subr.bf16.mxu1 %v2886_v10 }
 0x1b6   :  { %v146_v11 = vpop.permute.xlu0 %145  ;;  %v148_v12 = vpop.permute.xlu1 %147  ;;  %v3448_v18 = vld [vmem:[#allocation2 + $0x20] sm:$0xff]  ;;  %v3452_v21 = vld [vmem:[#allocation2 + $0x28] sm:$0xff] }
 0x1b7   :  { %152 = vst.msk [vmem:[#allocation2 + $0x40] sm:$0xff] %vm151_vm7, %v146_v11  ;;  %153 = vst.msk [vmem:[#allocation2 + $0x48] sm:$0xff] %vm151_vm7, %v148_v12 }
 0x1b8   :  { %2889 = vmatpush3.bf16.msra.mxu1 %v2886_v10 }
 0x1ba   :  { %v160_v15 = vpop.permute.xlu0 %159  ;;  %v162_v16 = vpop.permute.xlu1 %161  ;;  %v3454_v22 = vld [vmem:[#allocation2 + $0x30] sm:$0xff]  ;;  %v3458_v25 = vld [vmem:[#allocation2 + $0x38] sm:$0xff] }
 0x1bb   :  { %2667 = vmatmul.mubr.f32.vlgmr.msra.gmra.mrb[0].mxu1 %v3440_v13  ;;  %166 = vst.msk [vmem:[#allocation2 + $0x50] sm:$0xff] %vm165_vm8, %v160_v15  ;;  %167 = vst.msk [vmem:[#allocation2 + $0x58] sm:$0xff] %vm165_vm8, %v162_v16 }
 0x1bc   :  { %2669 = vmatprep.mubr.f32.mxu1 %v3442_v14 }
 0x1be   :  { %v174_v19 = vpop.permute.xlu0 %173  ;;  %v176_v20 = vpop.permute.xlu1 %175  ;;  %v3460_v26 = vld [vmem:[#allocation2 + $0x40] sm:$0xff]  ;;  %v3464_v27 = vld [vmem:[#allocation2 + $0x48] sm:$0xff] }
 0x1bf   :  { %2670 = vmatmul.mubr.f32.gmra.mrb[2].mxu1 %v3446_v17  ;;  %180 = vst.msk [vmem:[#allocation2 + $0x60] sm:$0xff] %vm179_vm9, %v174_v19  ;;  %181 = vst.msk [vmem:[#allocation2 + $0x68] sm:$0xff] %vm179_vm9, %v176_v20 }
 0x1c0   :  { %2672 = vmatprep.mubr.f32.mxu1 %v3448_v18 }
 0x1c2   :  { %v188_v23 = vpop.permute.xlu0 %187  ;;  %v190_v24 = vpop.permute.xlu1 %189  ;;  %v3466_v28 = vld [vmem:[#allocation2 + $0x50] sm:$0xff]  ;;  %v3470_v29 = vld [vmem:[#allocation2 + $0x58] sm:$0xff] }
 0x1c3   :  { %2673 = vmatmul.mubr.f32.gmra.mrb[4].mxu1 %v3452_v21  ;;  %194 = vst.msk [vmem:[#allocation2 + $0x70] sm:$0xff] %vm193_vm10, %v188_v23  ;;  %195 = vst.msk [vmem:[#allocation2 + $0x78] sm:$0xff] %vm193_vm10, %v190_v24 }
 0x1c4   :  { %2675 = vmatprep.mubr.f32.mxu1 %v3454_v22 }
 0x1c6   :  { %v3472_v30 = vld [vmem:[#allocation2 + $0x60] sm:$0xff]  ;;  %v3476_v31 = vld [vmem:[#allocation2 + $0x68] sm:$0xff] }
 0x1c7   :  { %2676 = vmatmul.mubr.f32.gmra.mrb[6].mxu1 %v3458_v25 }
 0x1c8   :  { %2678 = vmatprep.mubr.f32.mxu1 %v3460_v26 }
 0x1ca   :  { %v3478_v33 = vld [vmem:[#allocation2 + $0x70] sm:$0xff]  ;;  %v3482_v34 = vld [vmem:[#allocation2 + $0x78] sm:$0xff] }
 0x1cb   :  { %2679 = vmatmul.mubr.f32.gmra.mrb[8].mxu1 %v3464_v27 }
 0x1cc   :  { %2681 = vmatprep.mubr.f32.mxu1 %v3466_v28 }
 0x1cf   :  { %2682 = vmatmul.mubr.f32.gmra.mrb[10].mxu1 %v3470_v29 }
 0x1d0   :  { %2684 = vmatprep.mubr.f32.mxu1 %v3472_v30 }
 0x1d3   :  { %2685 = vmatmul.mubr.f32.gmra.mrb[12].mxu1 %v3476_v31 }
 0x1d4   :  { %2687 = vmatprep.mubr.f32.mxu1 %v3478_v33 }
 0x1d7   :  { %2688 = vmatmul.mubr.f32.gmra.mrb[14].mxu1 %v3482_v34 }
 0x28e   :  { %v2668_v42 = vpop.f32.mrb[0].mxu1 }
 0x28f   :  { %v438_v43 = vpop.f32.mrb[1].mxu1  ;;  %v518_v46 = vmul.f32 0.01, %v2668_v42 }
 0x290   :  { %v517_v47 = vmul.f32 0.01, %v438_v43 }
 0x291   :  { %v534_v52 = vmax.f32 %v2668_v42, %v518_v46 }
 0x292   :  { %v2671_v44 = vpop.f32.mrb[2].mxu1  ;;  %v533_v55 = vmax.f32 %v438_v43, %v517_v47 }
 0x293   :  { %v448_v45 = vpop.f32.mrb[3].mxu1  ;;  %v520_v53 = vmul.f32 0.01, %v2671_v44 }
 0x294   :  { %v519_v56 = vmul.f32 0.01, %v448_v45 }
 0x295   :  { %v536_v0 = vmax.f32 %v2671_v44, %v520_v53 }
 0x296   :  { %v2674_v48 = vpop.f32.mrb[4].mxu1  ;;  %v535_v2 = vmax.f32 %v448_v45, %v519_v56 }
 0x297   :  { %v522_v49 = vmul.f32 0.01, %v2674_v48  ;;  %v458_v50 = vpop.f32.mrb[5].mxu1 }
 0x298   :  { %v521_v51 = vmul.f32 0.01, %v458_v50 }
 0x299   :  { %v538_v54 = vmax.f32 %v2674_v48, %v522_v49 }
 0x29a   :  { %v537_v57 = vmax.f32 %v458_v50, %v521_v51  ;;  %v2677_v58 = vpop.f32.mrb[6].mxu1 }
 0x29b   :  { %v550_v59 = vmax.f32 %v534_v52, %v538_v54  ;;  %v524_v60 = vmul.f32 0.01, %v2677_v58  ;;  %v468_v61 = vpop.f32.mrb[7].mxu1 }
 0x29c   :  { %v549_v62 = vmax.f32 %v533_v55, %v537_v57  ;;  %v523_v63 = vmul.f32 0.01, %v468_v61 }
 0x29d   :  { %v540_v1 = vmax.f32 %v2677_v58, %v524_v60 }
 0x29e   :  { %v539_v3 = vmax.f32 %v468_v61, %v523_v63  ;;  %v2680_v4 = vpop.f32.mrb[8].mxu1 }
 0x29f   :  { %v552_v5 = vmax.f32 %v536_v0, %v540_v1  ;;  %v478_v6 = vpop.f32.mrb[9].mxu1  ;;  %v526_v10 = vmul.f32 0.01, %v2680_v4 }
 0x2a0   :  { %v551_v7 = vmax.f32 %v535_v2, %v539_v3  ;;  %v525_v11 = vmul.f32 0.01, %v478_v6 }
 0x2a1   :  { %v542_v20 = vmax.f32 %v2680_v4, %v526_v10 }
 0x2a2   :  { %v2683_v8 = vpop.f32.mrb[10].mxu1  ;;  %v541_v35 = vmax.f32 %v478_v6, %v525_v11 }
 0x2a3   :  { %v488_v9 = vpop.f32.mrb[11].mxu1  ;;  %v528_v23 = vmul.f32 0.01, %v2683_v8 }
 0x2a4   :  { %v527_v36 = vmul.f32 0.01, %v488_v9 }
 0x2a5   :  { %v544_v44 = vmax.f32 %v2683_v8, %v528_v23 }
 0x2a6   :  { %v2686_v12 = vpop.f32.mrb[12].mxu1  ;;  %v543_v47 = vmax.f32 %v488_v9, %v527_v36 }
 0x2a7   :  { %v530_v15 = vmul.f32 0.01, %v2686_v12  ;;  %v498_v16 = vpop.f32.mrb[13].mxu1 }
 0x2a8   :  { %v529_v19 = vmul.f32 0.01, %v498_v16 }
 0x2a9   :  { %v546_v24 = vmax.f32 %v2686_v12, %v530_v15 }
 0x2aa   :  { %v545_v37 = vmax.f32 %v498_v16, %v529_v19  ;;  %v2689_v38 = vpop.f32.mrb[14].mxu1 }
 0x2ab   :  { %v554_v39 = vmax.f32 %v542_v20, %v546_v24  ;;  %v532_v40 = vmul.f32 0.01, %v2689_v38  ;;  %v508_v41 = vpop.f32.mrb[15].mxu1 }
 0x2ac   :  { %v553_v42 = vmax.f32 %v541_v35, %v545_v37  ;;  %v531_v43 = vmul.f32 0.01, %v508_v41 }
 0x2ad   :  { %v3487_v45 = vmax.f32 %v550_v59, %v554_v39  ;;  %v548_v46 = vmax.f32 %v2689_v38, %v532_v40 }
 0x2ae   :  { %v547_v48 = vmax.f32 %v508_v41, %v531_v43  ;;  %v3489_v49 = vmax.f32 %v549_v62, %v553_v42  ;;  %v909_v42 = vld [vmem:[#allocation7 + $0x50] sm:$0xff]  ;;  %v910_v43 = vld [vmem:[#allocation7 + $0x58] sm:$0xff] }
 0x2af   :  { %v556_v50 = vmax.f32 %v544_v44, %v548_v46  ;;  %v562_v53 = vsel %vm220_vm1, %v3487_v45, 1.0  ;;  %v2930_v44 = vpack.c.bf16 %v910_v43, %v909_v42  ;;  %v911_v46 = vld [vmem:[#allocation7 + $0x60] sm:$0xff] }
 0x2b0   :  { %v555_v51 = vmax.f32 %v543_v47, %v547_v48  ;;  %v561_v52 = vsel %vm220_vm1, %v3489_v49, 1.0  ;;  %v912_v47 = vld [vmem:[#allocation7 + $0x68] sm:$0xff] }
 0x2b1   :  { %2700 = vmatprep.mubr.msk.f32.mxu0 %vm230_vm2, %v561_v52  ;;  %v3496_v54 = vmax.f32 %v552_v5, %v556_v50  ;;  %2931 = vmatprep.subr.bf16.mxu1 %v2930_v44  ;;  %v2934_v48 = vpack.c.bf16 %v912_v47, %v911_v46  ;;  %v913_v50 = vld [vmem:[#allocation7 + $0x70] sm:$0x1] }
 0x2b2   :  { %2701 = vmatmul.mubr.msk.f32.vlgmr.msra.gmra.mrb[4].mxu0 %vm230_vm2, %v562_v53  ;;  %v3499_v55 = vmax.f32 %v551_v7, %v555_v51  ;;  %2933 = vmatpush3.bf16.msra.mxu1 %v2930_v44 }
 0x2b3   :  { %v564_v57 = vsel %vm220_vm1, %v3496_v54, 1.0  ;;  %2935 = vmatprep.subr.bf16.mxu1 %v2934_v48 }
 0x2b4   :  { %v563_v56 = vsel %vm220_vm1, %v3499_v55, 1.0 }
 0x2b5   :  { %2703 = vmatprep.mubr.msk.f32.mxu0 %vm230_vm2, %v563_v56 }
 0x2b6   :  { %2704 = vmatmul.mubr.msk.f32.gmra.mrb[6].mxu0 %vm230_vm2, %v564_v57  ;;  %2937 = vmatpush3.bf16.msra.mxu1 %v2934_v48 }
 0x2b7   :  { %2738 = vmatprep.mubr.f32.mxu0 %v3431_v32  ;;  %2770 = vmatprep.subr.msk.mxu1 %vm243_vm3, %v913_v50 }
 0x2ba   :  { %2771 = vmatpush3.msk.msra.mxu1 %vm243_vm3, %v913_v50 }
 0x385   :  { %v2702_v58 = vpop.f32.mrb[4].mxu0 }
 0x386   :  { %v652_v59 = vpop.f32.mrb[5].mxu0 }
 0x387   :  { %v3120_v60 = vpack.i.bf16 %v2702_v58, %v652_v59  ;;  %v2898_v61 = vpack.c.bf16 %v2702_v58, %v652_v59 }
 0x389   :  { %3121 = vrot.lane.b32.xlu0 %v3120_v60, %s3292_s9  ;;  %v2705_v62 = vpop.f32.mrb[6].mxu0  ;;  %2899 = vmatprep.subr.bf16.mxu0 %v2898_v61 }
 0x38a   :  { %v662_v63 = vpop.f32.mrb[7].mxu0  ;;  %2901 = vmatpush3.bf16.msra.mxu0 %v2898_v61 }
 0x38b   :  { %v3125_v0 = vpack.i.bf16 %v2705_v62, %v662_v63  ;;  %v2902_v1 = vpack.c.bf16 %v2705_v62, %v662_v63 }
 0x38d   :  { %3131 = vrot.lane.b32.xlu0 %v3120_v60, %s3291_s3  ;;  %3126 = vrot.lane.b32.xlu1 %v3125_v0, %s3292_s9 }
 0x38e   :  { %2903 = vmatprep.subr.bf16.mxu0 %v2902_v1 }
 0x38f   :  { %2905 = vmatpush3.bf16.msra.mxu0 %v2902_v1 }
 0x391   :  { %3141 = vrot.lane.b32.xlu0 %v3120_v60, %s3293_s10  ;;  %3136 = vrot.lane.b32.xlu1 %v3125_v0, %s3291_s3 }
 0x395   :  { %3146 = vrot.lane.b32.xlu1 %v3125_v0, %s3293_s10 }
 0x3fb   :  { %v3122_v2 = vpop.permute.xlu0 %3121 }
 0x3fc   :  { %v3124_v3 = vunpack.i.h.bf16 %v3122_v2  ;;  %v3123_v4 = vunpack.i.l.bf16 %v3122_v2 }
 0x3fe   :  { %v2906_v5 = vpack.c.bf16 %v3124_v3, %v3123_v4 }
 0x3ff   :  { %v3132_v6 = vpop.permute.xlu0 %3131  ;;  %v3127_v7 = vpop.permute.xlu1 %3126 }
 0x400   :  { %v3134_v8 = vunpack.i.h.bf16 %v3132_v6  ;;  %v3133_v9 = vunpack.i.l.bf16 %v3132_v6  ;;  %v3129_v10 = vunpack.i.h.bf16 %v3127_v7  ;;  %v3128_v11 = vunpack.i.l.bf16 %v3127_v7  ;;  %2907 = vmatprep.subr.bf16.mxu0 %v2906_v5 }
 0x401   :  { %2909 = vmatpush3.bf16.msra.mxu0 %v2906_v5 }
 0x402   :  { %v2910_v12 = vpack.c.bf16 %v3129_v10, %v3128_v11  ;;  %v2914_v16 = vpack.c.bf16 %v3134_v8, %v3133_v9 }
 0x403   :  { %v3137_v15 = vpop.permute.xlu1 %3136  ;;  %v3142_v23 = vpop.permute.xlu0 %3141 }
 0x404   :  { %v3139_v19 = vunpack.i.h.bf16 %v3137_v15  ;;  %v3138_v20 = vunpack.i.l.bf16 %v3137_v15  ;;  %2911 = vmatprep.subr.bf16.mxu0 %v2910_v12  ;;  %v3144_v24 = vunpack.i.h.bf16 %v3142_v23  ;;  %v3143_v35 = vunpack.i.l.bf16 %v3142_v23 }
 0x405   :  { %2913 = vmatpush3.bf16.msra.mxu0 %v2910_v12 }
 0x406   :  { %2915 = vmatprep.subr.bf16.mxu0 %v2914_v16  ;;  %v2918_v36 = vpack.c.bf16 %v3139_v19, %v3138_v20  ;;  %v2922_v38 = vpack.c.bf16 %v3144_v24, %v3143_v35 }
 0x407   :  { %v3147_v37 = vpop.permute.xlu1 %3146 }
 0x408   :  { %v3149_v39 = vunpack.i.h.bf16 %v3147_v37  ;;  %v3148_v40 = vunpack.i.l.bf16 %v3147_v37 }
 0x409   :  { %2917 = vmatpush3.bf16.msra.mxu0 %v2914_v16 }
 0x40a   :  { %2919 = vmatprep.subr.bf16.mxu0 %v2918_v36  ;;  %v2926_v41 = vpack.c.bf16 %v3149_v39, %v3148_v40 }
 0x40d   :  { %2921 = vmatpush3.bf16.msra.mxu0 %v2918_v36 }
 0x40e   :  { %2923 = vmatprep.subr.bf16.mxu0 %v2922_v38 }
 0x411   :  { %2925 = vmatpush3.bf16.msra.mxu0 %v2922_v38 }
 0x412   :  { %2927 = vmatprep.subr.bf16.mxu0 %v2926_v41 }
 0x415   :  { %2929 = vmatpush3.bf16.msra.mxu0 %v2926_v41 }
 0x418   :  { %2739 = vmatmul.mubr.f32.vlgmr.msra.gmra.mrb[8].mxu0 %v3440_v13 }
 0x419   :  { %2741 = vmatprep.mubr.f32.mxu0 %v3442_v14 }
 0x41c   :  { %2742 = vmatmul.mubr.f32.gmra.mrb[10].mxu0 %v3446_v17 }
 0x41d   :  { %2744 = vmatprep.mubr.f32.mxu0 %v3448_v18 }
 0x420   :  { %2745 = vmatmul.mubr.f32.gmra.mrb[12].mxu0 %v3452_v21 }
 0x421   :  { %2747 = vmatprep.mubr.f32.mxu0 %v3454_v22 }
 0x424   :  { %2748 = vmatmul.mubr.f32.gmra.mrb[14].mxu0 %v3458_v25 }
 0x425   :  { %2750 = vmatprep.mubr.f32.mxu0 %v3460_v26 }
 0x428   :  { %2751 = vmatmul.mubr.f32.gmra.mrb[16].mxu0 %v3464_v27 }
 0x429   :  { %2753 = vmatprep.mubr.f32.mxu0 %v3466_v28 }
 0x42c   :  { %2754 = vmatmul.mubr.f32.gmra.mrb[18].mxu0 %v3470_v29 }
 0x42d   :  { %2756 = vmatprep.mubr.f32.mxu0 %v3472_v30 }
 0x430   :  { %2757 = vmatmul.mubr.f32.gmra.mrb[20].mxu0 %v3476_v31 }
 0x431   :  { %2759 = vmatprep.mubr.f32.mxu0 %v3478_v33 }
 0x434   :  { %2760 = vmatmul.mubr.f32.gmra.mrb[22].mxu0 %v3482_v34 }
 0x435   :  { %2810 = vmatprep.mubr.f32.mxu0 %v3431_v32 }
 0x4eb   :  { %v2740_v51 = vpop.f32.mrb[8].mxu0 }
 0x4ec   :  { %v777_v52 = vpop.f32.mrb[9].mxu0  ;;  %v857_v32 = vmul.f32 0.01, %v2740_v51 }
 0x4ed   :  { %v856_v57 = vmul.f32 0.01, %v777_v52 }
 0x4ee   :  { %v873_v62 = vmax.f32 %v2740_v51, %v857_v32 }
 0x4ef   :  { %v2743_v53 = vpop.f32.mrb[10].mxu0  ;;  %v872_v1 = vmax.f32 %v777_v52, %v856_v57 }
 0x4f0   :  { %v787_v56 = vpop.f32.mrb[11].mxu0  ;;  %v859_v63 = vmul.f32 0.01, %v2743_v53 }
 0x4f1   :  { %v858_v2 = vmul.f32 0.01, %v787_v56 }
 0x4f2   :  { %v875_v10 = vmax.f32 %v2743_v53, %v859_v63 }
 0x4f3   :  { %v2746_v58 = vpop.f32.mrb[12].mxu0  ;;  %v874_v12 = vmax.f32 %v787_v56, %v858_v2 }
 0x4f4   :  { %v861_v59 = vmul.f32 0.01, %v2746_v58  ;;  %v797_v60 = vpop.f32.mrb[13].mxu0 }
 0x4f5   :  { %v860_v61 = vmul.f32 0.01, %v797_v60 }
 0x4f6   :  { %v877_v0 = vmax.f32 %v2746_v58, %v861_v59 }
 0x4f7   :  { %v876_v3 = vmax.f32 %v797_v60, %v860_v61  ;;  %v2749_v4 = vpop.f32.mrb[14].mxu0 }
 0x4f8   :  { %v889_v5 = vmax.f32 %v873_v62, %v877_v0  ;;  %v863_v6 = vmul.f32 0.01, %v2749_v4  ;;  %v807_v7 = vpop.f32.mrb[15].mxu0 }
 0x4f9   :  { %v888_v8 = vmax.f32 %v872_v1, %v876_v3  ;;  %v862_v9 = vmul.f32 0.01, %v807_v7 }
 0x4fa   :  { %v879_v11 = vmax.f32 %v2749_v4, %v863_v6 }
 0x4fb   :  { %v878_v15 = vmax.f32 %v807_v7, %v862_v9  ;;  %v2752_v16 = vpop.f32.mrb[16].mxu0 }
 0x4fc   :  { %v891_v19 = vmax.f32 %v875_v10, %v879_v11  ;;  %v817_v20 = vpop.f32.mrb[17].mxu0  ;;  %v865_v36 = vmul.f32 0.01, %v2752_v16 }
 0x4fd   :  { %v890_v23 = vmax.f32 %v874_v12, %v878_v15  ;;  %v864_v37 = vmul.f32 0.01, %v817_v20 }
 0x4fe   :  { %v881_v42 = vmax.f32 %v2752_v16, %v865_v36 }
 0x4ff   :  { %v2755_v24 = vpop.f32.mrb[18].mxu0  ;;  %v880_v46 = vmax.f32 %v817_v20, %v864_v37 }
 0x500   :  { %v827_v35 = vpop.f32.mrb[19].mxu0  ;;  %v867_v43 = vmul.f32 0.01, %v2755_v24 }
 0x501   :  { %v866_v47 = vmul.f32 0.01, %v827_v35 }
 0x502   :  { %v883_v57 = vmax.f32 %v2755_v24, %v867_v43 }
 0x503   :  { %v2758_v38 = vpop.f32.mrb[20].mxu0  ;;  %v882_v60 = vmax.f32 %v827_v35, %v866_v47 }
 0x504   :  { %v869_v39 = vmul.f32 0.01, %v2758_v38  ;;  %v837_v40 = vpop.f32.mrb[21].mxu0 }
 0x505   :  { %v868_v41 = vmul.f32 0.01, %v837_v40 }
 0x506   :  { %v885_v44 = vmax.f32 %v2758_v38, %v869_v39 }
 0x507   :  { %v884_v48 = vmax.f32 %v837_v40, %v868_v41  ;;  %v2761_v50 = vpop.f32.mrb[22].mxu0 }
 0x508   :  { %v893_v51 = vmax.f32 %v881_v42, %v885_v44  ;;  %v871_v52 = vmul.f32 0.01, %v2761_v50  ;;  %v847_v53 = vpop.f32.mrb[23].mxu0 }
 0x509   :  { %v892_v56 = vmax.f32 %v880_v46, %v884_v48  ;;  %v870_v32 = vmul.f32 0.01, %v847_v53 }
 0x50a   :  { %v897_v58 = vmax.f32 %v889_v5, %v893_v51  ;;  %v887_v59 = vmax.f32 %v2761_v50, %v871_v52 }
 0x50b   :  { %v896_v61 = vmax.f32 %v888_v8, %v892_v56  ;;  %v886_v62 = vmax.f32 %v847_v53, %v870_v32 }
 0x50c   :  { %v3533_v63 = vadd.f32 %v897_v58, %v3487_v45  ;;  %v895_v0 = vmax.f32 %v883_v57, %v887_v59 }
 0x50d   :  { %v894_v1 = vmax.f32 %v882_v60, %v886_v62  ;;  %v3536_v2 = vadd.f32 %v896_v61, %v3489_v49 }
 0x50e   :  { %v899_v3 = vmax.f32 %v891_v19, %v895_v0  ;;  %v905_v5 = vsel %vm220_vm1, %v3533_v63, 1.0 }
 0x50f   :  { %v898_v4 = vmax.f32 %v890_v23, %v894_v1  ;;  %v904_v6 = vsel %vm220_vm1, %v3536_v2, 1.0 }
 0x510   :  { %2772 = vmatprep.mubr.msk.f32.mxu1 %vm230_vm2, %v904_v6  ;;  %v3544_v7 = vadd.f32 %v899_v3, %v3496_v54 }
 0x511   :  { %2773 = vmatmul.mubr.msk.f32.vlgmr.msra.gmra.mrb[16].mxu1 %vm230_vm2, %v905_v5  ;;  %v3548_v45 = vadd.f32 %v898_v4, %v3499_v55 }
 0x512   :  { %v907_v8 = vsel %vm220_vm1, %v3544_v7, 1.0 }
 0x513   :  { %v906_v49 = vsel %vm220_vm1, %v3548_v45, 1.0 }
 0x514   :  { %2775 = vmatprep.mubr.msk.f32.mxu1 %vm230_vm2, %v906_v49 }
 0x515   :  { %2776 = vmatmul.mubr.msk.f32.gmra.mrb[18].mxu1 %vm230_vm2, %v907_v8 }
 0x5e4   :  { %v2774_v9 = vpop.f32.mrb[16].mxu1 }
 0x5e5   :  { %v995_v10 = vpop.f32.mrb[17].mxu1 }
 0x5e6   :  { %v3150_v11 = vpack.i.bf16 %v2774_v9, %v995_v10  ;;  %v2938_v54 = vpack.c.bf16 %v2774_v9, %v995_v10 }
 0x5e8   :  { %3151 = vrot.lane.b32.xlu0 %v3150_v11, %s3292_s9  ;;  %v2777_v12 = vpop.f32.mrb[18].mxu1  ;;  %2939 = vmatprep.subr.bf16.mxu0 %v2938_v54 }
 0x5e9   :  { %v1005_v55 = vpop.f32.mrb[19].mxu1  ;;  %2941 = vmatpush3.bf16.msra.mxu0 %v2938_v54 }
 0x5ea   :  { %v3155_v15 = vpack.i.bf16 %v2777_v12, %v1005_v55  ;;  %v2942_v16 = vpack.c.bf16 %v2777_v12, %v1005_v55 }
 0x5ec   :  { %3161 = vrot.lane.b32.xlu0 %v3150_v11, %s3291_s3  ;;  %3156 = vrot.lane.b32.xlu1 %v3155_v15, %s3292_s9 }
 0x5ed   :  { %2943 = vmatprep.subr.bf16.mxu0 %v2942_v16 }
 0x5ee   :  { %2945 = vmatpush3.bf16.msra.mxu0 %v2942_v16 }
 0x5f0   :  { %3171 = vrot.lane.b32.xlu0 %v3150_v11, %s3293_s10  ;;  %3166 = vrot.lane.b32.xlu1 %v3155_v15, %s3291_s3 }
 0x5f4   :  { %3176 = vrot.lane.b32.xlu1 %v3155_v15, %s3293_s10 }
 0x65a   :  { %v3152_v19 = vpop.permute.xlu0 %3151 }
 0x65b   :  { %v3154_v20 = vunpack.i.h.bf16 %v3152_v19  ;;  %v3153_v23 = vunpack.i.l.bf16 %v3152_v19 }
 0x65d   :  { %v2946_v24 = vpack.c.bf16 %v3154_v20, %v3153_v23 }
 0x65e   :  { %v3162_v35 = vpop.permute.xlu0 %3161  ;;  %v3157_v36 = vpop.permute.xlu1 %3156 }
 0x65f   :  { %v3164_v37 = vunpack.i.h.bf16 %v3162_v35  ;;  %v3163_v38 = vunpack.i.l.bf16 %v3162_v35  ;;  %v3159_v39 = vunpack.i.h.bf16 %v3157_v36  ;;  %v3158_v40 = vunpack.i.l.bf16 %v3157_v36  ;;  %2947 = vmatprep.subr.bf16.mxu0 %v2946_v24 }
 0x660   :  { %2949 = vmatpush3.bf16.msra.mxu0 %v2946_v24 }
 0x661   :  { %v2950_v41 = vpack.c.bf16 %v3159_v39, %v3158_v40  ;;  %v2954_v43 = vpack.c.bf16 %v3164_v37, %v3163_v38 }
 0x662   :  { %v3167_v42 = vpop.permute.xlu1 %3166  ;;  %v3172_v47 = vpop.permute.xlu0 %3171 }
 0x663   :  { %v3169_v44 = vunpack.i.h.bf16 %v3167_v42  ;;  %v3168_v46 = vunpack.i.l.bf16 %v3167_v42  ;;  %2951 = vmatprep.subr.bf16.mxu0 %v2950_v41  ;;  %v3174_v48 = vunpack.i.h.bf16 %v3172_v47  ;;  %v3173_v50 = vunpack.i.l.bf16 %v3172_v47 }
 0x664   :  { %2953 = vmatpush3.bf16.msra.mxu0 %v2950_v41 }
 0x665   :  { %2955 = vmatprep.subr.bf16.mxu0 %v2954_v43  ;;  %v2958_v51 = vpack.c.bf16 %v3169_v44, %v3168_v46  ;;  %v2962_v53 = vpack.c.bf16 %v3174_v48, %v3173_v50 }
 0x666   :  { %v3177_v52 = vpop.permute.xlu1 %3176 }
 0x667   :  { %v3179_v56 = vunpack.i.h.bf16 %v3177_v52  ;;  %v3178_v32 = vunpack.i.l.bf16 %v3177_v52 }
 0x668   :  { %2957 = vmatpush3.bf16.msra.mxu0 %v2954_v43 }
 0x669   :  { %2959 = vmatprep.subr.bf16.mxu0 %v2958_v51  ;;  %v2966_v57 = vpack.c.bf16 %v3179_v56, %v3178_v32 }
 0x66c   :  { %2961 = vmatpush3.bf16.msra.mxu0 %v2958_v51 }
 0x66d   :  { %2963 = vmatprep.subr.bf16.mxu0 %v2962_v53 }
 0x670   :  { %2965 = vmatpush3.bf16.msra.mxu0 %v2962_v53 }
 0x671   :  { %2967 = vmatprep.subr.bf16.mxu0 %v2966_v57 }
 0x674   :  { %2969 = vmatpush3.bf16.msra.mxu0 %v2966_v57 }
 0x677   :  { %2811 = vmatmul.mubr.f32.vlgmr.msra.gmra.mrb[24].mxu0 %v3440_v13  ;;  %v1251_v13 = vld [vmem:[#allocation8] sm:$0xff] }
 0x678   :  { %2813 = vmatprep.mubr.f32.mxu0 %v3442_v14  ;;  %v1252_v14 = vld [vmem:[#allocation8 + $0x8] sm:$0xff] }
 0x67b   :  { %2814 = vmatmul.mubr.f32.gmra.mrb[26].mxu0 %v3446_v17  ;;  %v2970_v17 = vpack.c.bf16 %v1252_v14, %v1251_v13 }
 0x67c   :  { %2816 = vmatprep.mubr.f32.mxu0 %v3448_v18  ;;  %v1253_v18 = vld [vmem:[#allocation8 + $0x10] sm:$0xff] }
 0x67d   :  { %2971 = vmatprep.subr.bf16.mxu1 %v2970_v17 }
 0x67e   :  { %2973 = vmatpush3.bf16.msra.mxu1 %v2970_v17 }
 0x67f   :  { %2817 = vmatmul.mubr.f32.gmra.mrb[28].mxu0 %v3452_v21  ;;  %v1254_v21 = vld [vmem:[#allocation8 + $0x18] sm:$0xff] }
 0x680   :  { %2819 = vmatprep.mubr.f32.mxu0 %v3454_v22  ;;  %v2974_v22 = vpack.c.bf16 %v1254_v21, %v1253_v18 }
 0x682   :  { %2975 = vmatprep.subr.bf16.mxu1 %v2974_v22 }
 0x683   :  { %2820 = vmatmul.mubr.f32.gmra.mrb[30].mxu0 %v3458_v25  ;;  %2977 = vmatpush3.bf16.msra.mxu1 %v2974_v22  ;;  %v1255_v25 = vld [vmem:[#allocation8 + $0x20] sm:$0x1] }
 0x684   :  { %2822 = vmatprep.mubr.f32.mxu0 %v3460_v26  ;;  %2842 = vmatprep.subr.msk.mxu1 %vm243_vm3, %v1255_v25 }
 0x687   :  { %2823 = vmatmul.mubr.f32.gmra.mrb[32].mxu0 %v3464_v27  ;;  %2843 = vmatpush3.msk.msra.mxu1 %vm243_vm3, %v1255_v25 }
 0x688   :  { %2825 = vmatprep.mubr.f32.mxu0 %v3466_v28 }
 0x68b   :  { %2826 = vmatmul.mubr.f32.gmra.mrb[34].mxu0 %v3470_v29 }
 0x68c   :  { %2828 = vmatprep.mubr.f32.mxu0 %v3472_v30 }
 0x68f   :  { %2829 = vmatmul.mubr.f32.gmra.mrb[36].mxu0 %v3476_v31 }
 0x690   :  { %2831 = vmatprep.mubr.f32.mxu0 %v3478_v33 }
 0x693   :  { %2832 = vmatmul.mubr.f32.gmra.mrb[38].mxu0 %v3482_v34 }
 0x74a   :  { %v2812_v26 = vpop.f32.mrb[24].mxu0 }
 0x74b   :  { %v1120_v27 = vpop.f32.mrb[25].mxu0  ;;  %v1200_v30 = vmul.f32 0.01, %v2812_v26 }
 0x74c   :  { %v1199_v31 = vmul.f32 0.01, %v1120_v27 }
 0x74d   :  { %v1216_v60 = vmax.f32 %v2812_v26, %v1200_v30 }
 0x74e   :  { %v2815_v28 = vpop.f32.mrb[26].mxu0  ;;  %v1215_v0 = vmax.f32 %v1120_v27, %v1199_v31 }
 0x74f   :  { %v1130_v29 = vpop.f32.mrb[27].mxu0  ;;  %v1202_v61 = vmul.f32 0.01, %v2815_v28 }
 0x750   :  { %v1201_v1 = vmul.f32 0.01, %v1130_v29 }
 0x751   :  { %v1218_v10 = vmax.f32 %v2815_v28, %v1202_v61 }
 0x752   :  { %v2818_v33 = vpop.f32.mrb[28].mxu0  ;;  %v1217_v54 = vmax.f32 %v1130_v29, %v1201_v1 }
 0x753   :  { %v1204_v34 = vmul.f32 0.01, %v2818_v33  ;;  %v1140_v58 = vpop.f32.mrb[29].mxu0 }
 0x754   :  { %v1203_v59 = vmul.f32 0.01, %v1140_v58 }
 0x755   :  { %v1220_v62 = vmax.f32 %v2818_v33, %v1204_v34 }
 0x756   :  { %v1219_v3 = vmax.f32 %v1140_v58, %v1203_v59  ;;  %v2821_v4 = vpop.f32.mrb[30].mxu0  ;;  %v3298_v58 = vmov 1966171168  }
 0x757   :  { %v1232_v6 = vmax.f32 %v1216_v60, %v1220_v62  ;;  %v1206_v5 = vmul.f32 0.01, %v2821_v4  ;;  %v1150_v49 = vpop.f32.mrb[31].mxu0  ;;  %v1475_v59 = vunpack.c.l.s4 %v3298_v58  ;;  %v1477_v60 = vlaneseq }
 0x758   :  { %v1231_v8 = vmax.f32 %v1215_v0, %v1219_v3  ;;  %v1205_v9 = vmul.f32 0.01, %v1150_v49 }
 0x759   :  { %v1222_v11 = vmax.f32 %v2821_v4, %v1206_v5  ;;  %v1476_v61 = vunpack.c.0.s8 %v1475_v59  ;;  %v1478_v62 = vshrl.u32 %v1477_v60, 7 }
 0x75a   :  { %v1221_v12 = vmax.f32 %v1150_v49, %v1205_v9  ;;  %v2824_v55 = vpop.f32.mrb[32].mxu0 }
 0x75b   :  { %v1234_v15 = vmax.f32 %v1218_v10, %v1222_v11  ;;  %v1160_v16 = vpop.f32.mrb[33].mxu0  ;;  %v1208_v24 = vmul.f32 0.01, %v2824_v55  ;;  %v3615_v0 = vsub.s32 %v1476_v61, %v1478_v62 }
 0x75c   :  { %v1233_v19 = vmax.f32 %v1217_v54, %v1221_v12  ;;  %v1207_v35 = vmul.f32 0.01, %v1160_v16 }
 0x75d   :  { %v1224_v40 = vmax.f32 %v2824_v55, %v1208_v24  ;;  %v3634_v55 = vsub.s32 0, %v1478_v62 }
 0x75e   :  { %v2827_v20 = vpop.f32.mrb[34].mxu0  ;;  %v1223_v43 = vmax.f32 %v1160_v16, %v1207_v35 }
 0x75f   :  { %v1170_v23 = vpop.f32.mrb[35].mxu0  ;;  %v1210_v41 = vmul.f32 0.01, %v2827_v20 }
 0x760   :  { %v1209_v44 = vmul.f32 0.01, %v1170_v23 }
 0x761   :  { %v1226_v56 = vmax.f32 %v2827_v20, %v1210_v41 }
 0x762   :  { %v2830_v36 = vpop.f32.mrb[36].mxu0  ;;  %v1225_v13 = vmax.f32 %v1170_v23, %v1209_v44 }
 0x763   :  { %v1212_v37 = vmul.f32 0.01, %v2830_v36  ;;  %v1180_v38 = vpop.f32.mrb[37].mxu0 }
 0x764   :  { %v1211_v39 = vmul.f32 0.01, %v1180_v38 }
 0x765   :  { %v1228_v42 = vmax.f32 %v2830_v36, %v1212_v37 }
 0x766   :  { %v1227_v46 = vmax.f32 %v1180_v38, %v1211_v39  ;;  %v2833_v47 = vpop.f32.mrb[38].mxu0 }
 0x767   :  { %v1236_v48 = vmax.f32 %v1224_v40, %v1228_v42  ;;  %v1214_v50 = vmul.f32 0.01, %v2833_v47  ;;  %v1190_v51 = vpop.f32.mrb[39].mxu0 }
 0x768   :  { %v1235_v52 = vmax.f32 %v1223_v43, %v1227_v46  ;;  %v1213_v53 = vmul.f32 0.01, %v1190_v51 }
 0x769   :  { %v1240_v32 = vmax.f32 %v1232_v6, %v1236_v48  ;;  %v1230_v57 = vmax.f32 %v2833_v47, %v1214_v50 }
 0x76a   :  { %v1239_v14 = vmax.f32 %v1231_v8, %v1235_v52  ;;  %v1229_v17 = vmax.f32 %v1190_v51, %v1213_v53 }
 0x76b   :  { %v1244_v18 = vadd.f32 %v1240_v32, %v3533_v63  ;;  %v1238_v21 = vmax.f32 %v1226_v56, %v1230_v57 }
 0x76c   :  { %v1237_v22 = vmax.f32 %v1225_v13, %v1229_v17  ;;  %v1243_v25 = vadd.f32 %v1239_v14, %v3536_v2 }
 0x76d   :  { %v1242_v26 = vmax.f32 %v1234_v15, %v1238_v21  ;;  %v1248_v29 = vsel %vm220_vm1, %v1244_v18, 1.0 }
 0x76e   :  { %v1241_v27 = vmax.f32 %v1233_v19, %v1237_v22  ;;  %v1247_v28 = vsel %vm220_vm1, %v1243_v25, 1.0 }
 0x76f   :  { %2844 = vmatprep.mubr.msk.f32.mxu1 %vm230_vm2, %v1247_v28  ;;  %v1246_v30 = vadd.f32 %v1242_v26, %v3544_v7 }
 0x770   :  { %2845 = vmatmul.mubr.msk.f32.vlgmr.msra.gmra.mrb[20].mxu1 %vm230_vm2, %v1248_v29  ;;  %v1245_v31 = vadd.f32 %v1241_v27, %v3548_v45 }
 0x771   :  { %v1250_v2 = vsel %vm220_vm1, %v1246_v30, 1.0 }
 0x772   :  { %v1249_v63 = vsel %vm220_vm1, %v1245_v31, 1.0 }
 0x773   :  { %2847 = vmatprep.mubr.msk.f32.mxu1 %vm230_vm2, %v1249_v63 }
 0x774   :  { %2848 = vmatmul.mubr.msk.f32.gmra.mrb[22].mxu1 %vm230_vm2, %v1250_v2 }
 0x843   :  { %v3591_v33 = vpop.f32.mrb[20].mxu1 }
 0x844   :  { %1653 = vrot.lane.b32.xlu1 %v3591_v33, %s3292_s9  ;;  %v3595_v34 = vpop.f32.mrb[21].mxu1  ;;  %v1529_v1 = vrot.slane %v3591_v33, %v3615_v0  ;;  %v1522_v6 = vcombine.high %v3591_v33, %v3591_v33 }
 0x845   :  { %1651 = vrot.lane.b32.xlu0 %v3595_v34, %s3292_s9  ;;  %v1480_v3 = vrot.slane %v3595_v34, %v3615_v0  ;;  %v1473_v11 = vcombine.high %v3595_v34, %v3595_v34 }
 0x846   :  { %v1537_v49 = vcombine.high %v1529_v1, %v1529_v1  ;;  %v1545_v9 = vrot.slane %v1529_v1, %v3615_v0  ;;  %v3632_v12 = vrot.slane %v1522_v6, %v3615_v0 }
 0x847   :  { %v3599_v7 = vpop.f32.mrb[22].mxu1  ;;  %v1488_v8 = vcombine.high %v1480_v3, %v1480_v3  ;;  %v3637_v15 = vrot.slane %v1480_v3, %v3615_v0  ;;  %v3652_v36 = vrot.slane %v1473_v11, %v3615_v0 }
 0x848   :  { %1901 = vrot.lane.b32.xlu1 %v3599_v7, %s3292_s9  ;;  %v3603_v45 = vpop.f32.mrb[23].mxu1  ;;  %v1777_v4 = vrot.slane %v3599_v7, %v3615_v0  ;;  %v3640_v19 = vrot.slane %v1537_v49, %v3615_v0  ;;  %v1567_v23 = vcombine.high %v1545_v9, %v1545_v9  ;;  %v3656_v38 = vrot.slane %v3632_v12, %v3615_v0 }
 0x849   :  { %1899 = vrot.lane.b32.xlu0 %v3603_v45, %s3292_s9  ;;  %v1728_v5 = vrot.slane %v3603_v45, %v3615_v0  ;;  %v3643_v20 = vrot.slane %v1488_v8, %v3615_v0  ;;  %v1518_v39 = vcombine.high %v3637_v15, %v3637_v15  ;;  %v1574_v40 = vrot.slane %v3637_v15, %v3634_v55 }
 0x84a   :  { %v1785_v10 = vcombine.high %v1777_v4, %v1777_v4  ;;  %v1793_v54 = vrot.slane %v1777_v4, %v3615_v0  ;;  %v1770_v43 = vcombine.high %v3599_v7, %v3599_v7  ;;  %v1606_v44 = vrot.slane %v1545_v9, %v3634_v55 }
 0x84b   :  { %v1736_v16 = vcombine.high %v1728_v5, %v1728_v5  ;;  %v3649_v35 = vrot.slane %v1728_v5, %v3615_v0  ;;  %v1578_v42 = vrot.slane %v3643_v20, %v3634_v55  ;;  %v1610_v46 = vrot.slane %v3640_v19, %v3634_v55 }
 0x84c   :  { %1362 = vrot.lane.b32.xlu1 %v3591_v33, %s3291_s3  ;;  %v3646_v24 = vrot.slane %v1785_v10, %v3615_v0  ;;  %v1815_v37 = vcombine.high %v1793_v54, %v1793_v54  ;;  %v1854_v50 = vrot.slane %v1793_v54, %v3634_v55  ;;  %v1614_v52 = vrot.slane %v1567_v23, %v3634_v55 }
 0x84d   :  { %1360 = vrot.lane.b32.xlu0 %v3595_v34, %s3291_s3  ;;  %v3663_v41 = vrot.slane %v1736_v16, %v3615_v0  ;;  %v1822_v47 = vrot.slane %v3649_v35, %v3634_v55  ;;  %v1569_v27 = vcombine.high %v3640_v19, %v3640_v19 }
 0x84e   :  { %v1858_v51 = vrot.slane %v3646_v24, %v3634_v55  ;;  %v1862_v13 = vrot.slane %v1815_v37, %v3634_v55  ;;  %v1817_v15 = vcombine.high %v3646_v24, %v3646_v24 }
 0x84f   :  { %v1826_v14 = vrot.slane %v3663_v41, %v3634_v55 }
 0x850   :  { %1366 = vrot.lane.b32.xlu1 %v3599_v7, %s3291_s3 }
 0x851   :  { %1364 = vrot.lane.b32.xlu0 %v3603_v45, %s3291_s3 }
 0x8b6   :  { %v3674_v48 = vpop.permute.xlu1 %1653 }
 0x8b7   :  { %v3680_v53 = vpop.permute.xlu0 %1651  ;;  %v1674_v56 = vmul.f32 %v3674_v48, %v1606_v44  ;;  %v1658_v32 = vmul.f32 %v3674_v48, %v1574_v40  ;;  %v1676_v57 = vmul.f32 %v3674_v48, %v1610_v46  ;;  %v3692_v26 = vmul.f32 %v3674_v48, %v1578_v42 }
 0x8b8   :  { %v1673_v17 = vmul.f32 %v3680_v53, %v1606_v44  ;;  %v1657_v18 = vmul.f32 %v3680_v53, %v1574_v40  ;;  %v1675_v21 = vmul.f32 %v3680_v53, %v1610_v46  ;;  %v1659_v62 = vmul.f32 %v3680_v53, %v1578_v42 }
 0x8b9   :  { %v1706_v22 = vmax.f32 %v1674_v56, 0.0  ;;  %v1690_v25 = vmax.f32 %v1658_v32, 0.0  ;;  %v1708_v63 = vmax.f32 %v1676_v57, 0.0  ;;  %v1677_v6 = vmul.f32 %v3680_v53, %v1614_v52 }
 0x8ba   :  { %v3696_v28 = vpop.permute.xlu1 %1901  ;;  %v1705_v29 = vmax.f32 %v1673_v17, 0.0  ;;  %v1689_v30 = vmax.f32 %v1657_v18, 0.0  ;;  %v1707_v31 = vmax.f32 %v1675_v21, 0.0  ;;  %v1678_v19 = vmul.f32 %v3674_v48, %v1614_v52 }
 0x8bb   :  { %v3704_v58 = vpop.permute.xlu0 %1899  ;;  %v1922_v59 = vmul.f32 %v3696_v28, %v1854_v50  ;;  %v1906_v60 = vmul.f32 %v3696_v28, %v1822_v47  ;;  %v1924_v61 = vmul.f32 %v3696_v28, %v1858_v51  ;;  %v1692_v44 = vmax.f32 %v3692_v26, 0.0 }
 0x8bc   :  { %v2978_v1 = vpack.c.bf16 %v1706_v22, %v1705_v29  ;;  %v2981_v3 = vpack.c.bf16 %v1690_v25, %v1689_v30  ;;  %v1921_v4 = vmul.f32 %v3704_v58, %v1854_v50  ;;  %v1905_v49 = vmul.f32 %v3704_v58, %v1822_v47 }
 0x8bd   :  { %v1954_v5 = vmax.f32 %v1922_v59, 0.0  ;;  %v1938_v8 = vmax.f32 %v1906_v60, 0.0  ;;  %v1923_v9 = vmul.f32 %v3704_v58, %v1858_v51  ;;  %v2984_v11 = vpack.c.bf16 %v1708_v63, %v1707_v31 }
 0x8be   :  { %2980 = vmatprep.subr.msk.bf16.mxu1 %vm3700_vm12, %v2978_v1  ;;  %v1363_v10 = vpop.permute.xlu1 %1362  ;;  %v1953_v54 = vmax.f32 %v1921_v4, 0.0  ;;  %v1956_v16 = vmax.f32 %v1924_v61, 0.0  ;;  %v1937_v40 = vmax.f32 %v1905_v49, 0.0  ;;  %v1691_v50 = vmax.f32 %v1659_v62, 0.0 }
 0x8bf   :  { %2983 = vmatpush3.bf16.xpose.msk.msra.mxu1 %vm3700_vm12, %v2981_v3  ;;  %v1361_v23 = vpop.permute.xlu0 %1360  ;;  %v1376_v37 = vsel %vm1372_vm11, %v1363_v10, 0.0  ;;  %v1955_v42 = vmax.f32 %v1923_v9, 0.0  ;;  %v1907_v51 = vmul.f32 %v3704_v58, %v1826_v14  ;;  %v1709_v56 = vmax.f32 %v1677_v6, 0.0 }
 0x8c0   :  { %2986 = vmatprep.subr.msk.bf16.mxu1 %vm3700_vm12, %v2984_v11  ;;  %1377 = vadd.xlane.f32.xlu1 %v1376_v37  ;;  %v1373_v46 = vsel %vm1372_vm11, %v1361_v23, 0.0  ;;  %v3026_v47 = vpack.c.bf16 %v1954_v5, %v1953_v54  ;;  %v3029_v52 = vpack.c.bf16 %v1938_v8, %v1937_v40  ;;  %v1710_v32 = vmax.f32 %v1678_v19, 0.0 }
 0x8c1   :  { %1374 = vadd.xlane.f32.xlu0 %v1373_v46  ;;  %v1908_v57 = vmul.f32 %v3696_v28, %v1826_v14  ;;  %v1582_v17 = vrot.slane %v1518_v39, %v3634_v55  ;;  %v3032_v18 = vpack.c.bf16 %v1956_v16, %v1955_v42  ;;  %v1925_v21 = vmul.f32 %v3704_v58, %v1862_v13 }
 0x8c2   :  { %3028 = vmatprep.subr.msk.bf16.mxu0 %vm3700_vm12, %v3026_v47  ;;  %v1926_v22 = vmul.f32 %v3696_v28, %v1862_v13  ;;  %v1766_v25 = vcombine.high %v3649_v35, %v3649_v35  ;;  %v1939_v14 = vmax.f32 %v1907_v51, 0.0  ;;  %v1618_v29 = vrot.slane %v1569_v27, %v3634_v55  ;;  %v1367_v27 = vpop.permute.xlu1 %1366 }
 0x8c3   :  { %v1365_v26 = vpop.permute.xlu0 %1364  ;;  %3031 = vmatpush3.bf16.xpose.msk.msra.mxu0 %vm3700_vm12, %v3029_v52  ;;  %v1940_v30 = vmax.f32 %v1908_v57, 0.0  ;;  %v1661_v13 = vmul.f32 %v3680_v53, %v1582_v17  ;;  %v1662_v35 = vmul.f32 %v3674_v48, %v1582_v17  ;;  %v1520_v31 = vcombine.high %v3643_v20, %v3643_v20 }
 0x8c4   :  { %3034 = vmatprep.subr.msk.bf16.mxu0 %vm3700_vm12, %v3032_v18  ;;  %v1379_v39 = vsel %vm1372_vm11, %v1365_v26, 0.0  ;;  %v1721_v63 = vcombine.high %v3603_v45, %v3603_v45  ;;  %v2987_v59 = vpack.c.bf16 %v1692_v44, %v1691_v50  ;;  %v2990_v24 = vpack.c.bf16 %v1710_v32, %v1709_v56 }
 0x8c5   :  { %1380 = vadd.xlane.f32.xlu0 %v1379_v39  ;;  %v1957_v60 = vmax.f32 %v1925_v21, 0.0  ;;  %v1958_v61 = vmax.f32 %v1926_v22, 0.0  ;;  %v1679_v62 = vmul.f32 %v3680_v53, %v1618_v29  ;;  %v1680_v1 = vmul.f32 %v3674_v48, %v1618_v29 }
 0x8c6   :  { %v3756_v3 = vrot.slane %v1770_v43, %v3615_v0  ;;  %v1768_v20 = vcombine.high %v3663_v41, %v3663_v41  ;;  %v1830_v4 = vrot.slane %v1766_v25, %v3634_v55  ;;  %v1866_v6 = vrot.slane %v1817_v15, %v3634_v55 }
 0x8c7   :  { %2989 = vmatpush3.bf16.xpose.msk.msra.mxu1 %vm3700_vm12, %v2987_v59  ;;  %v1382_v5 = vsel %vm1372_vm11, %v1367_v27, 0.0  ;;  %v3035_v49 = vpack.c.bf16 %v1940_v30, %v1939_v14  ;;  %v1693_v8 = vmax.f32 %v1661_v13, 0.0  ;;  %v1694_v9 = vmax.f32 %v1662_v35, 0.0 }
 0x8c8   :  { %2992 = vmatprep.subr.msk.bf16.mxu1 %vm3700_vm12, %v2990_v24  ;;  %v1909_v43 = vmul.f32 %v3704_v58, %v1830_v4  ;;  %v1910_v41 = vmul.f32 %v3696_v28, %v1830_v4  ;;  %v1927_v10 = vmul.f32 %v3704_v58, %v1866_v6  ;;  %v1928_v11 = vmul.f32 %v3696_v28, %v1866_v6 }
 0x8c9   :  { %1383 = vadd.xlane.f32.xlu0 %v1382_v5  ;;  %v3038_v54 = vpack.c.bf16 %v1958_v61, %v1957_v60  ;;  %v1711_v16 = vmax.f32 %v1679_v62, 0.0  ;;  %v1712_v19 = vmax.f32 %v1680_v1, 0.0  ;;  %v1586_v23 = vrot.slane %v1520_v31, %v3634_v55 }
 0x8ca   :  { %v1538_v37 = vcombine.high %v3632_v12, %v3632_v12  ;;  %v1489_v40 = vcombine.high %v3652_v36, %v3652_v36  ;;  %v3778_v42 = vrot.slane %v3756_v3, %v3615_v0  ;;  %v3781_v44 = vrot.slane %v1721_v63, %v3615_v0 }
 0x8cb   :  { %3037 = vmatpush3.bf16.xpose.msk.msra.mxu0 %vm3700_vm12, %v3035_v49  ;;  %v2993_v46 = vpack.c.bf16 %v1694_v9, %v1693_v8  ;;  %v1663_v47 = vmul.f32 %v3680_v53, %v1586_v23  ;;  %v1664_v12 = vmul.f32 %v3674_v48, %v1586_v23  ;;  %v1622_v50 = vrot.slane %v3656_v38, %v3634_v55 }
 0x8cc   :  { %3040 = vmatprep.subr.msk.bf16.mxu0 %vm3700_vm12, %v3038_v54  ;;  %v1941_v51 = vmax.f32 %v1909_v43, 0.0  ;;  %v1942_v52 = vmax.f32 %v1910_v41, 0.0  ;;  %v1959_v56 = vmax.f32 %v1927_v10, 0.0  ;;  %v1960_v32 = vmax.f32 %v1928_v11, 0.0 }
 0x8cd   :  { %v2996_v57 = vpack.c.bf16 %v1712_v19, %v1711_v16  ;;  %v1681_v17 = vmul.f32 %v3680_v53, %v1622_v50  ;;  %v1682_v18 = vmul.f32 %v3674_v48, %v1622_v50  ;;  %v1834_v21 = vrot.slane %v1768_v20, %v3634_v55 }
 0x8ce   :  { %v3796_v22 = vrot.slane %v3652_v36, %v3615_v0  ;;  %v1786_v25 = vcombine.high %v3756_v3, %v3756_v3  ;;  %v1870_v26 = vrot.slane %v3778_v42, %v3634_v55  ;;  %v3805_v14 = vrot.slane %v1538_v37, %v3615_v0 }
 0x8cf   :  { %2995 = vmatpush3.bf16.xpose.msk.msra.mxu1 %vm3700_vm12, %v2993_v46  ;;  %v1695_v29 = vmax.f32 %v1663_v47, 0.0  ;;  %v1696_v15 = vmax.f32 %v1664_v12, 0.0  ;;  %v1911_v36 = vmul.f32 %v3704_v58, %v1834_v21  ;;  %v1912_v39 = vmul.f32 %v3696_v28, %v1834_v21 }
 0x8d0   :  { %2998 = vmatprep.subr.msk.bf16.mxu1 %vm3700_vm12, %v2996_v57  ;;  %v3813_v30 = vrot.slane %v3781_v44, %v3615_v0  ;;  %v3041_v13 = vpack.c.bf16 %v1942_v52, %v1941_v51  ;;  %v3044_v35 = vpack.c.bf16 %v1960_v32, %v1959_v56  ;;  %v1713_v31 = vmax.f32 %v1681_v17, 0.0 }
 0x8d1   :  { %v1714_v63 = vmax.f32 %v1682_v18, 0.0  ;;  %v1929_v27 = vmul.f32 %v3704_v58, %v1870_v26  ;;  %v1930_v59 = vmul.f32 %v3696_v28, %v1870_v26  ;;  %v3818_v24 = vrot.slane %v1489_v40, %v3615_v0  ;;  %v3870_v26 = vld [vmem:[%s4004_s4] sm:$0xf] }
 0x8d2   :  { %v1590_v60 = vrot.slane %v3796_v22, %v3634_v55  ;;  %v1626_v61 = vrot.slane %v3805_v14, %v3634_v55  ;;  %v2999_v62 = vpack.c.bf16 %v1696_v15, %v1695_v29  ;;  %v1943_v1 = vmax.f32 %v1911_v36, 0.0  ;;  %2582 = vmatprep.mubr.msk.f32.mxu1 %vm220_vm1, %v3870_v26  ;;  %2616 = vmatprep.mubr.msk.f32.mxu0 %vm220_vm1, %v3870_v26 }
 0x8d3   :  { %3043 = vmatpush3.bf16.xpose.msk.msra.mxu0 %vm3700_vm12, %v3041_v13  ;;  %v1944_v3 = vmax.f32 %v1912_v39, 0.0  ;;  %v3829_v20 = vrot.slane %v1786_v25, %v3615_v0  ;;  %v1838_v8 = vrot.slane %v3813_v30, %v3634_v55  ;;  %v3002_v9 = vpack.c.bf16 %v1714_v63, %v1713_v31 }
 0x8d4   :  { %3046 = vmatprep.subr.msk.bf16.mxu0 %vm3700_vm12, %v3044_v35  ;;  %v1665_v4 = vmul.f32 %v3680_v53, %v1590_v60  ;;  %v1666_v6 = vmul.f32 %v3674_v48, %v1590_v60  ;;  %v1683_v5 = vmul.f32 %v3680_v53, %v1626_v61  ;;  %v1684_v49 = vmul.f32 %v3674_v48, %v1626_v61 }
 0x8d5   :  { %v1961_v43 = vmax.f32 %v1929_v27, 0.0  ;;  %v1962_v41 = vmax.f32 %v1930_v59, 0.0  ;;  %v1737_v10 = vcombine.high %v3781_v44, %v3781_v44  ;;  %v1568_v11 = vcombine.high %v3656_v38, %v3656_v38 }
 0x8d6   :  { %v3047_v54 = vpack.c.bf16 %v1944_v3, %v1943_v1  ;;  %v1913_v16 = vmul.f32 %v3704_v58, %v1838_v8  ;;  %v1914_v19 = vmul.f32 %v3696_v28, %v1838_v8  ;;  %v1874_v23 = vrot.slane %v3829_v20, %v3634_v55 }
 0x8d7   :  { %3001 = vmatpush3.bf16.xpose.msk.msra.mxu1 %vm3700_vm12, %v2999_v62  ;;  %v1697_v37 = vmax.f32 %v1665_v4, 0.0  ;;  %v1698_v40 = vmax.f32 %v1666_v6, 0.0  ;;  %v1715_v44 = vmax.f32 %v1683_v5, 0.0  ;;  %v1716_v46 = vmax.f32 %v1684_v49, 0.0 }
 0x8d8   :  { %3004 = vmatprep.subr.msk.bf16.mxu1 %vm3700_vm12, %v3002_v9  ;;  %v3050_v47 = vpack.c.bf16 %v1962_v41, %v1961_v43  ;;  %v1931_v12 = vmul.f32 %v3704_v58, %v1874_v23  ;;  %v1932_v38 = vmul.f32 %v3696_v28, %v1874_v23  ;;  %v1594_v50 = vrot.slane %v3818_v24, %v3634_v55 }
 0x8d9   :  { %v3854_v51 = vrot.slane %v1737_v10, %v3615_v0  ;;  %v1630_v52 = vrot.slane %v1568_v11, %v3634_v55  ;;  %v1816_v56 = vcombine.high %v3778_v42, %v3778_v42  ;;  %v1945_v32 = vmax.f32 %v1913_v16, 0.0 }
 0x8da   :  { %v1946_v57 = vmax.f32 %v1914_v19, 0.0  ;;  %v1667_v17 = vmul.f32 %v3680_v53, %v1594_v50  ;;  %v1668_v18 = vmul.f32 %v3674_v48, %v1594_v50  ;;  %v1519_v0 = vcombine.high %v3796_v22, %v3796_v22 }
 0x8db   :  { %3049 = vmatpush3.bf16.xpose.msk.msra.mxu0 %vm3700_vm12, %v3047_v54  ;;  %v3005_v21 = vpack.c.bf16 %v1698_v40, %v1697_v37  ;;  %v3008_v25 = vpack.c.bf16 %v1716_v46, %v1715_v44  ;;  %v1963_v42 = vmax.f32 %v1931_v12, 0.0  ;;  %v1964_v29 = vmax.f32 %v1932_v38, 0.0 }
 0x8dc   :  { %3052 = vmatprep.subr.msk.bf16.mxu0 %vm3700_vm12, %v3050_v47  ;;  %v1685_v15 = vmul.f32 %v3680_v53, %v1630_v52  ;;  %v1686_v36 = vmul.f32 %v3674_v48, %v1630_v52  ;;  %v1842_v22 = vrot.slane %v3854_v51, %v3634_v55  ;;  %v1878_v39 = vrot.slane %v1816_v56, %v3634_v55 }
 0x8dd   :  { %v3053_v13 = vpack.c.bf16 %v1946_v57, %v1945_v32  ;;  %v1699_v35 = vmax.f32 %v1667_v17, 0.0  ;;  %v1700_v31 = vmax.f32 %v1668_v18, 0.0  ;;  %v1570_v63 = vcombine.high %v3805_v14, %v3805_v14 }
 0x8de   :  { %v1915_v27 = vmul.f32 %v3704_v58, %v1842_v22  ;;  %v1916_v59 = vmul.f32 %v3696_v28, %v1842_v22  ;;  %v1933_v60 = vmul.f32 %v3704_v58, %v1878_v39  ;;  %v1934_v61 = vmul.f32 %v3696_v28, %v1878_v39 }
 0x8df   :  { %3007 = vmatpush3.bf16.xpose.msk.msra.mxu1 %vm3700_vm12, %v3005_v21  ;;  %v3056_v62 = vpack.c.bf16 %v1964_v29, %v1963_v42  ;;  %v1717_v1 = vmax.f32 %v1685_v15, 0.0  ;;  %v1718_v3 = vmax.f32 %v1686_v36, 0.0  ;;  %v1598_v4 = vrot.slane %v1519_v0, %v3634_v55 }
 0x8e0   :  { %3010 = vmatprep.subr.msk.bf16.mxu1 %vm3700_vm12, %v3008_v25  ;;  %v1767_v6 = vcombine.high %v3813_v30, %v3813_v30  ;;  %v1818_v14 = vcombine.high %v3829_v20, %v3829_v20  ;;  %v3011_v5 = vpack.c.bf16 %v1700_v31, %v1699_v35  ;;  %v1634_v9 = vrot.slane %v1570_v63, %v3634_v55 }
 0x8e1   :  { %v1669_v49 = vmul.f32 %v3680_v53, %v1598_v4  ;;  %v1670_v8 = vmul.f32 %v3674_v48, %v1598_v4  ;;  %v1947_v43 = vmax.f32 %v1915_v27, 0.0  ;;  %v1948_v41 = vmax.f32 %v1916_v59, 0.0 }
 0x8e2   :  { %v1965_v10 = vmax.f32 %v1933_v60, 0.0  ;;  %v1966_v30 = vmax.f32 %v1934_v61, 0.0  ;;  %v3014_v11 = vpack.c.bf16 %v1718_v3, %v1717_v1  ;;  %v1687_v54 = vmul.f32 %v3680_v53, %v1634_v9 }
 0x8e3   :  { %3055 = vmatpush3.bf16.xpose.msk.msra.mxu0 %vm3700_vm12, %v3053_v13  ;;  %v1688_v16 = vmul.f32 %v3674_v48, %v1634_v9  ;;  %v1521_v20 = vcombine.high %v3818_v24, %v3818_v24  ;;  %v1846_v19 = vrot.slane %v1767_v6, %v3634_v55  ;;  %v1769_v23 = vcombine.high %v3854_v51, %v3854_v51 }
 0x8e4   :  { %3058 = vmatprep.subr.msk.bf16.mxu0 %vm3700_vm12, %v3056_v62  ;;  %v1701_v37 = vmax.f32 %v1669_v49, 0.0  ;;  %v1702_v40 = vmax.f32 %v1670_v8, 0.0  ;;  %v1882_v44 = vrot.slane %v1818_v14, %v3634_v55  ;;  %v3059_v46 = vpack.c.bf16 %v1948_v41, %v1947_v43 }
 0x8e5   :  { %v3062_v47 = vpack.c.bf16 %v1966_v30, %v1965_v10  ;;  %v1917_v12 = vmul.f32 %v3704_v58, %v1846_v19  ;;  %v1918_v24 = vmul.f32 %v3696_v28, %v1846_v19  ;;  %v1719_v38 = vmax.f32 %v1687_v54, 0.0 }
 0x8e6   :  { %v1720_v50 = vmax.f32 %v1688_v16, 0.0  ;;  %v1935_v52 = vmul.f32 %v3704_v58, %v1882_v44  ;;  %v1936_v56 = vmul.f32 %v3696_v28, %v1882_v44  ;;  %v1602_v51 = vrot.slane %v1521_v20, %v3634_v55 }
 0x8e7   :  { %3013 = vmatpush3.bf16.xpose.msk.msra.mxu1 %vm3700_vm12, %v3011_v5  ;;  %v3017_v32 = vpack.c.bf16 %v1702_v40, %v1701_v37  ;;  %v1949_v57 = vmax.f32 %v1917_v12, 0.0  ;;  %v1950_v17 = vmax.f32 %v1918_v24, 0.0  ;;  %v1850_v29 = vrot.slane %v1769_v23, %v3634_v55 }
 0x8e8   :  { %3016 = vmatprep.subr.msk.bf16.mxu1 %vm3700_vm12, %v3014_v11  ;;  %v1671_v18 = vmul.f32 %v3680_v53, %v1602_v51  ;;  %v1672_v0 = vmul.f32 %v3674_v48, %v1602_v51  ;;  %v3020_v21 = vpack.c.bf16 %v1720_v50, %v1719_v38  ;;  %v1967_v25 = vmax.f32 %v1935_v52, 0.0 }
 0x8e9   :  { %v1968_v42 = vmax.f32 %v1936_v56, 0.0  ;;  %v1919_v15 = vmul.f32 %v3704_v58, %v1850_v29  ;;  %v3065_v36 = vpack.c.bf16 %v1950_v17, %v1949_v57  ;;  %v1920_v53 = vmul.f32 %v3696_v28, %v1850_v29 }
 0x8ea   :  { %v1703_v22 = vmax.f32 %v1671_v18, 0.0  ;;  %v1704_v39 = vmax.f32 %v1672_v0, 0.0  ;;  %v3299_v62 = vmov 32  }
 0x8eb   :  { %3061 = vmatpush3.bf16.xpose.msk.msra.mxu0 %vm3700_vm12, %v3059_v46  ;;  %v3068_v13 = vpack.c.bf16 %v1968_v42, %v1967_v25  ;;  %v1951_v48 = vmax.f32 %v1919_v15, 0.0  ;;  %v1952_v35 = vmax.f32 %v1920_v53, 0.0  ;;  %3180 = vset.pattern.permute.xlu1 %v3299_v62 }
 0x8ec   :  { %3064 = vmatprep.subr.msk.bf16.mxu0 %vm3700_vm12, %v3062_v47  ;;  %v3023_v55 = vpack.c.bf16 %v1704_v39, %v1703_v22  ;;  %3181 = vset.pattern.permute.xlu0 %v3299_v62 }
 0x8ed   :  { %v3071_v31 = vpack.c.bf16 %v1952_v35, %v1951_v48 }
 0x8ef   :  { %3019 = vmatpush3.bf16.xpose.msk.msra.mxu1 %vm3700_vm12, %v3017_v32 }
 0x8f0   :  { %3022 = vmatprep.subr.msk.bf16.mxu1 %vm3700_vm12, %v3020_v21 }
 0x8f3   :  { %3067 = vmatpush3.bf16.xpose.msk.msra.mxu0 %vm3700_vm12, %v3065_v36 }
 0x8f4   :  { %3070 = vmatprep.subr.msk.bf16.mxu0 %vm3700_vm12, %v3068_v13 }
 0x8f7   :  { %3025 = vmatpush3.bf16.xpose.msk.msra.mxu1 %vm3700_vm12, %v3023_v55 }
 0x8fb   :  { %3073 = vmatpush3.bf16.xpose.msk.msra.mxu0 %vm3700_vm12, %v3071_v31 }
 0x8fe   :  { %2583 = vmatmul.mubr.msk.f32.vlgmr.msra.gmra.mrb[24].mxu1 %vm220_vm1, %v3870_v26 }
 0x902   :  { %2617 = vmatmul.mubr.msk.f32.vlgmr.msra.gmra.mrb[40].mxu0 %vm220_vm1, %v3870_v26 }
 0x94d   :  { %v1378_v28 = vpop.xlane.xlu1 %1377 }
 0x94e   :  { %v3945_v58 = vmul.f32 0.2, %v1378_v28  ;;  %v1375_v63 = vpop.xlane.xlu0 %1374 }
 0x94f   :  { %v3947_v27 = vmul.f32 0.2, %v1375_v63 }
 0x950   :  { %v1391_v59 = vsub.f32 %v3591_v33, %v3945_v58 }
 0x951   :  { %v1390_v60 = vsub.f32 %v3595_v34, %v3947_v27 }
 0x952   :  { %v1395_v2 = vmul.f32 %v1391_v59, %v1391_v59  ;;  %v1381_v61 = vpop.xlane.xlu0 %1380 }
 0x953   :  { %v1394_v1 = vmul.f32 %v1390_v60, %v1390_v60  ;;  %v3953_v3 = vmul.f32 0.2, %v1381_v61 }
 0x954   :  { %1404 = vrot.lane.b32.xlu0 %v1395_v2, %s3291_s3 }
 0x955   :  { %v1392_v4 = vsub.f32 %v3603_v45, %v3953_v3  ;;  %1402 = vrot.lane.b32.xlu1 %v1394_v1, %s3291_s3 }
 0x956   :  { %v1384_v6 = vpop.xlane.xlu0 %1383 }
 0x957   :  { %v1396_v33 = vmul.f32 %v1392_v4, %v1392_v4  ;;  %v3959_v14 = vmul.f32 0.2, %v1384_v6 }
 0x959   :  { %v1393_v34 = vsub.f32 %v3599_v7, %v3959_v14  ;;  %1406 = vrot.lane.b32.xlu1 %v1396_v33, %s3291_s3 }
 0x95b   :  { %v1397_v5 = vmul.f32 %v1393_v34, %v1393_v34 }
 0x95d   :  { %1408 = vrot.lane.b32.xlu1 %v1397_v5, %s3291_s3 }
 0x9c6   :  { %v1405_v49 = vpop.permute.xlu0 %1404 }
 0x9c7   :  { %v1403_v8 = vpop.permute.xlu1 %1402  ;;  %v1417_v9 = vsel %vm1372_vm11, %v1405_v49, 0.0 }
 0x9c8   :  { %1418 = vadd.xlane.f32.xlu1 %v1417_v9  ;;  %v1414_v45 = vsel %vm1372_vm11, %v1403_v8, 0.0 }
 0x9c9   :  { %1415 = vadd.xlane.f32.xlu0 %v1414_v45 }
 0x9cb   :  { %v1407_v43 = vpop.permute.xlu1 %1406 }
 0x9cc   :  { %v1420_v41 = vsel %vm1372_vm11, %v1407_v43, 0.0 }
 0x9cd   :  { %1421 = vadd.xlane.f32.xlu0 %v1420_v41 }
 0x9cf   :  { %v1409_v10 = vpop.permute.xlu1 %1408 }
 0x9d0   :  { %v1423_v7 = vsel %vm1372_vm11, %v1409_v10, 0.0 }
 0x9d1   :  { %1424 = vadd.xlane.f32.xlu0 %v1423_v7  ;;  %v2235_v30 = vpop.f32.mrb[24].mxu1 }
 0x9d2   :  { %v2237_v54 = vpop.f32.mrb[25].mxu1 }
 0x9d5   :  { %v2306_v11 = vpop.f32.mrb[40].mxu0 }
 0x9d6   :  { %v2308_v16 = vpop.f32.mrb[41].mxu0 }
 0x9d9   :  { %1972 = vperm.xlu1 %3180, %v3870_v26  }
 0xa55   :  { %v1419_v20 = vpop.xlane.xlu1 %1418 }
 0xa56   :  { %v1428_v19 = vmul.f32 0.25, %v1419_v20  ;;  %v1416_v23 = vpop.xlane.xlu0 %1415 }
 0xa57   :  { %v1427_v37 = vmul.f32 0.25, %v1416_v23 }
 0xa58   :  { %v1432_v40 = vadd.f32 1e-05, %v1428_v19 }
 0xa59   :  { %v1431_v44 = vadd.f32 1e-05, %v1427_v37  ;;  %v1973_v46 = vpop.permute.xlu1 %1972 }
 0xa5a   :  { %3182 = vrsqrt.f32 %v1432_v40  ;;  %v1422_v47 = vpop.xlane.xlu0 %1421  ;;  %v2236_v24 = vadd.f32 %v2235_v30, %v1973_v46  ;;  %v2307_v38 = vadd.f32 %v2306_v11, %v1973_v46  ;;  %v2238_v50 = vadd.f32 %v2237_v54, %v1973_v46 }
 0xa5b   :  { %3184 = vrsqrt.f32 %v1431_v44  ;;  %v1429_v12 = vmul.f32 0.25, %v1422_v47  ;;  %v2309_v52 = vadd.f32 %v2308_v16, %v1973_v46  ;;  %vm1444_vm15 = vcmp.eq.f32.partialorder %v1432_v40, inf }
 0xa5c   :  { %v2315_v51 = vcombine.low %v2236_v24, %v2238_v50  ;;  %v1447_v25 = vand.u32 2147483648, %v1432_v40  ;;  %vm1446_vm0 = vcmp.eq.f32.partialorder %v1432_v40, 0.0  ;;  %vm1437_vm1 = vcmp.eq.f32.partialorder %v1431_v44, inf }
 0xa5d   :  { %v1433_v26 = vadd.f32 1e-05, %v1429_v12  ;;  %v2316_v57 = vcombine.low %v2307_v38, %v2309_v52  ;;  %v1440_v15 = vand.u32 2147483648, %v1431_v44  ;;  %vm1439_vm2 = vcmp.eq.f32.partialorder %v1431_v44, 0.0 }
 0xa5e   :  { %v1425_v56 = vpop.xlane.xlu0 %1424  ;;  %2319 = vst [vmem:[%s4006_s6] sm:$0xff] %v2315_v51 }
 0xa5f   :  { %v1430_v32 = vmul.f32 0.25, %v1425_v56  ;;  %3186 = vrsqrt.f32 %v1433_v26  ;;  %2320 = vst [vmem:[%s4006_s6 + $0x8] sm:$0xff] %v2316_v57  ;;  %vm1451_vm3 = vcmp.eq.f32.partialorder %v1433_v26, inf  ;;  %v1454_v35 = vand.u32 2147483648, %v1433_v26 }
 0xa60   :  { %vm1453_vm4 = vcmp.eq.f32.partialorder %v1433_v26, 0.0 }
 0xa61   :  { %v1434_v17 = vadd.f32 1e-05, %v1430_v32 }
 0xa63   :  { %3188 = vrsqrt.f32 %v1434_v17  ;;  %vm1458_vm5 = vcmp.eq.f32.partialorder %v1434_v17, inf  ;;  %v1461_v60 = vand.u32 2147483648, %v1434_v17  ;;  %vm1460_vm6 = vcmp.eq.f32.partialorder %v1434_v17, 0.0 }
 0xa64   :  { %v3183_v18 = vpop.eup %3182 }
 0xa65   :  { %v3185_v0 = vpop.eup %3184  ;;  %v1443_v21 = vmul.f32 %v3183_v18, %v1432_v40 }
 0xa66   :  { %v1436_v42 = vmul.f32 %v3185_v0, %v1431_v44 }
 0xa67   :  { %v1445_v29 = vsel %vm1444_vm15, %v1432_v40, %v1443_v21 }
 0xa68   :  { %v1448_v36 = vsel %vm1446_vm0, %v1447_v25, %v1445_v29  ;;  %v1438_v22 = vsel %vm1437_vm1, %v1431_v44, %v1436_v42 }
 0xa69   :  { %v1465_v39 = vsel %vm1463_vm13, %v3945_v58, %v1448_v36  ;;  %v1441_v53 = vsel %vm1439_vm2, %v1440_v15, %v1438_v22  ;;  %v3187_v13 = vpop.eup %3186 }
 0xa6a   :  { %1470 = vst.msk [vmem:[%s4005_s5 + $0x8] sm:$0xff] %vm1468_vm14, %v1465_v39  ;;  %v1464_v55 = vsel %vm1463_vm13, %v3947_v27, %v1441_v53  ;;  %v1450_v48 = vmul.f32 %v3187_v13, %v1433_v26 }
 0xa6b   :  { %1469 = vst.msk [vmem:[%s4005_s5] sm:$0xff] %vm1468_vm14, %v1464_v55 }
 0xa6c   :  { %v1452_v28 = vsel %vm1451_vm3, %v1433_v26, %v1450_v48 }
 0xa6d   :  { %v3189_v31 = vpop.eup %3188  ;;  %v1455_v58 = vsel %vm1453_vm4, %v1454_v35, %v1452_v28 }
 0xa6e   :  { %v1457_v63 = vmul.f32 %v3189_v31, %v1434_v17  ;;  %v1466_v59 = vsel %vm1463_vm13, %v3953_v3, %v1455_v58 }
 0xa6f   :  { %1471 = vst.msk [vmem:[%s4005_s5 + $0x10] sm:$0xff] %vm1468_vm14, %v1466_v59 }
 0xa70   :  { %v1459_v27 = vsel %vm1458_vm5, %v1434_v17, %v1457_v63 }
 0xa71   :  { %v1462_v2 = vsel %vm1460_vm6, %v1461_v60, %v1459_v27 }
 0xa72   :  { %v1467_v61 = vsel %vm1463_vm13, %v3959_v14, %v1462_v2 }
 0xa73   :  { %1472 = vst.msk [vmem:[%s4005_s5 + $0x18] sm:$0xff] %vm1468_vm14, %v1467_v61 }
 0xa74   :  { %2329 = vsyncpa [#allocation4], 1 }
 0xa75   :  { %2330 = vsyncpa [#allocation6], 1 }
 0xa76   :  { %2331 = vsyncpa [#allocation9], 1 }

</bundles_post_ra>
